<compile_context>
chip_gen: v7x
topology: tpu7x:2x2x1
jax: 0.10.0
libtpu: 0.0.40
codegen_flags: <defaults>
</compile_context>

<pallas_src>
import functools

import jax
import jax.numpy as jnp
from jax.experimental import pallas as pl
from jax.experimental.pallas import tpu as pltpu

BN_EPS = 1e-5
LANE = 128
SUBLANE = 8


def _cdiv(a, b):
    return (a + b - 1) // b


def _round_up(x, m):
    return _cdiv(x, m) * m


def _pick_row_tile(n, f_in, f_out, *, max_tile=2048, min_tile=512, min_steps=8,
                   vmem_budget=12 * 1024 * 1024):
    """Row tile: as large as HBM-bound efficiency wants, but
    (a) double-buffered in+out footprint <= vmem_budget (v7x 64 MiB safe),
    (b) grid keeps >= min_steps steps when N allows (megacore + pipeline),
    (c) always a multiple of 8 sublanes."""
    n8 = _round_up(max(n, 1), SUBLANE)
    row_bytes = 4 * (2 * f_in + f_out)             # x tile + concat-output tile
    cap = max(SUBLANE, (vmem_budget // (2 * row_bytes)) // SUBLANE * SUBLANE)
    tn = min(max_tile, cap, n8)
    want = _round_up(_cdiv(n8, min_steps), SUBLANE)
    tn = min(tn, max(min_tile, want))
    return max(SUBLANE, min(tn, n8) // SUBLANE * SUBLANE)


# ---------------------------------------------------------------------------
# Pass 1: per-TensorCore partial BN statistics (sum, sum of squares).
# ---------------------------------------------------------------------------
def _bn_stats_kernel(x_ref, out_ref, *, n_rows, tn, tiles_per_core, mask_rows):
    j = pl.program_id(1)

    @pl.when(j == 0)
    def _():
        out_ref[...] = jnp.zeros_like(out_ref)

    x = x_ref[...]                                            # (tn, F_in) f32
    if mask_rows:
        # Un-clamped tile index -> global row ids; rows beyond the true N
        # (ragged last tile, or a clamped duplicate tile on the spare core
        # step) contribute exactly zero.
        tile = pl.program_id(0) * tiles_per_core + j
        row = tile * tn + jax.lax.broadcasted_iota(jnp.int32, (tn, 1), 0)
        x = jnp.where(row < n_rows, x, 0.0)

    # Per-sublane partial sums: pure full-vreg VALU adds every step; the
    # cross-sublane / cross-core reduce happens once in the wrapper.
    xg = x.reshape(tn // SUBLANE, SUBLANE, x.shape[-1])
    out_ref[0] += jnp.sum(xg, axis=0)                         # (8, F_in) sums
    out_ref[1] += jnp.sum(xg * xg, axis=0)                    # (8, F_in) sumsq


# ---------------------------------------------------------------------------
# Pass 2: fused (BN-folded) Linear + ReLU + concat([act, residual]).
# ---------------------------------------------------------------------------
def _fused_kernel(x_ref, w_ref, b_ref, out_ref, *, f_out):
    x = x_ref[...]                                            # (tn, F_in) f32
    lin = jnp.dot(x.astype(w_ref.dtype), w_ref[...],
                  preferred_element_type=jnp.float32)         # MXU, f32 acc
    act = jnp.maximum(lin + b_ref[...], 0.0)                  # f32 bias + ReLU
    if f_out % LANE == 0:
        out_ref[:, :f_out] = act                              # lane-aligned
        out_ref[:, f_out:] = x                                # residual copy
    else:
        # Ragged F_out: one in-register concat + full-width store instead of a
        # whole-output epilogue copy in the wrapper.
        out_ref[...] = jnp.concatenate([act, x], axis=1)


def residual_block_concat(x, weight_t, bias, gamma, beta, *,
                          max_block_n=2048, matmul_dtype=jnp.bfloat16):
    """Forward of residualBlockConcat (training-mode BN batch statistics).

    x        : (N, F_in)         f32
    weight_t : (F_in, F_out)     f32  (PyTorch Linear weight, transposed)
    bias     : (F_out,)/(1,F_out)
    gamma    : (F_in,)/(1,F_in)       BatchNorm1d weight
    beta     : (F_in,)/(1,F_in)       BatchNorm1d bias
    returns  : (N, F_out + F_in) f32 == concat([relu(linear(bn(x))), x], 1)
    """
    n, f_in = x.shape
    f_out = weight_t.shape[1]

    xf = x.astype(jnp.float32)
    w = weight_t.astype(jnp.float32)
    b = bias.reshape(1, f_out).astype(jnp.float32)
    g = gamma.reshape(1, f_in).astype(jnp.float32)
    bt = beta.reshape(1, f_in).astype(jnp.float32)

    tn = _pick_row_tile(n, f_in, f_out, max_tile=max_block_n)
    nb = _cdiv(n, tn)                    # row tiles (no over-padding of N)
    tpc = _cdiv(nb, 2)                   # row tiles per TensorCore
    mask_rows = (nb * tn != n) or (2 * tpc != nb)

    # ---- Pass 1: per-core partial BN statistics ---------------------------
    def x_tile_map(c, j):
        # Clamp so a core's spare step re-reads an in-bounds tile; the kernel
        # row mask (from the *unclamped* index) zeroes its contribution.
        return (jnp.minimum(c * tpc + j, nb - 1), 0)

    partial = pl.pallas_call(
        functools.partial(_bn_stats_kernel, n_rows=n, tn=tn,
                          tiles_per_core=tpc, mask_rows=mask_rows),
        out_shape=jax.ShapeDtypeStruct((2, 2, SUBLANE, f_in), jnp.float32),
        grid=(2, tpc),
        in_specs=[pl.BlockSpec((tn, f_in), x_tile_map)],
        out_specs=pl.BlockSpec((None, 2, SUBLANE, f_in),
                               lambda c, j: (c, 0, 0, 0)),
        compiler_params=pltpu.CompilerParams(
            dimension_semantics=("parallel", "arbitrary")),
    )(xf)

    sums = jnp.sum(partial, axis=(0, 2))         # cross-core + sublane combine
    inv_n = 1.0 / n                              # divide by TRUE N
    mean = sums[0:1] * inv_n
    # One-pass biased variance (matches PyTorch forward normalization).
    # TODO(synk): switch to per-tile Chan/Welford combination if inputs can
    # have |mean| >> std or N gets extremely large (f32 cancellation).
    var = jnp.maximum(sums[1:2] * inv_n - mean * mean, 0.0)

    # ---- Fold BN into the Linear (tiny one-time work, plain JAX) ----------
    s = g * jax.lax.rsqrt(var + BN_EPS)                        # (1, F_in)
    w_folded = (w * s.T).astype(matmul_dtype)                  # (F_in, F_out)
    b_folded = b + jnp.dot(bt - mean * s, w,
                           precision=jax.lax.Precision.HIGHEST)  # (1, F_out)

    # ---- Pass 2: fused matmul + ReLU + concat, row-parallel ---------------
    # TODO(synk): when N*F_in*4 fits comfortably in VMEM, fuse passes 1 and 2
    # into a single pallas_call with a phase axis so x is read from HBM once.
    out = pl.pallas_call(
        functools.partial(_fused_kernel, f_out=f_out),
        out_shape=jax.ShapeDtypeStruct((n, f_out + f_in), jnp.float32),
        grid=(nb,),
        in_specs=[
            pl.BlockSpec((tn, f_in), lambda i: (i, 0)),
            pl.BlockSpec((f_in, f_out), lambda i: (0, 0)),
            pl.BlockSpec((1, f_out), lambda i: (0, 0)),
        ],
        out_specs=pl.BlockSpec((tn, f_out + f_in), lambda i: (i, 0)),
        compiler_params=pltpu.CompilerParams(
            dimension_semantics=("parallel",),
            vmem_limit_bytes=32 * 1024 * 1024),
    )(xf, w_folded, b_folded)
    return out


# ---------------------------------------------------------------------------
# Pure-JAX reference (exact math) and test harness
# ---------------------------------------------------------------------------
def _reference(x, weight_t, bias, gamma, beta):
    x = x.astype(jnp.float32)
    mean = jnp.mean(x, axis=0, keepdims=True)
    var = jnp.mean((x - mean) ** 2, axis=0, keepdims=True)   # biased, like fwd BN
    bn = (x - mean) * jax.lax.rsqrt(var + BN_EPS) * gamma.reshape(1, -1) \
         + beta.reshape(1, -1)
    lin = jnp.dot(bn, weight_t, precision=jax.lax.Precision.HIGHEST) \
          + bias.reshape(1, -1)
    return jnp.concatenate([jnp.maximum(lin, 0.0), x], axis=1)


def _make_inputs(key, n, f_in, f_out):
    kx, kw, kb = jax.random.split(key, 3)
    x = jax.random.normal(kx, (n, f_in), dtype=jnp.float32)
    bound = 1.0 / float(f_in) ** 0.5               # nn.Linear default init range
    w = jax.random.uniform(kw, (f_out, f_in), jnp.float32, -bound, bound)
    b = jax.random.uniform(kb, (f_out,), jnp.float32, -bound, bound)
    gamma = jnp.ones((1, f_in), jnp.float32)       # fresh BatchNorm1d affine
    beta = jnp.zeros((1, f_in), jnp.float32)
    return x, w.T, b.reshape(1, f_out), gamma, beta


if __name__ == "__main__":
    key = jax.random.PRNGKey(0)
    k1, k2, k3 = jax.random.split(key, 3)

    run_bf16 = jax.jit(functools.partial(residual_block_concat,
                                         matmul_dtype=jnp.bfloat16))
    run_f32 = jax.jit(functools.partial(residual_block_concat,
                                        matmul_dtype=jnp.float32))

    # Case 1: lane-aligned, multi-tile shapes (fast path, bf16 MXU operands).
    n, f_in, f_out = 1024, 128, 256
    args = _make_inputs(k1, n, f_in, f_out)
    out = jax.block_until_ready(run_bf16(*args))
    ref = _reference(*args)
    assert out.shape == (n, f_out + f_in)
    assert jnp.array_equal(out[:, f_out:], args[0])           # residual bit-exact
    assert jnp.allclose(out[:, :f_out], ref[:, :f_out], atol=2.5e-2, rtol=2.5e-2)

    out32 = jax.block_until_ready(run_f32(*args))             # tight f32 check
    assert jnp.allclose(out32, ref, atol=2e-3, rtol=2e-3)

    # Case 2: ragged N (not a multiple of the tile or of 8), aligned features:
    # exercises partial edge blocks, stats row masking and the per-core split.
    n2, f_in2, f_out2 = 997, 128, 256
    args2 = _make_inputs(k2, n2, f_in2, f_out2)
    out2 = jax.block_until_ready(run_f32(*args2))
    ref2 = _reference(*args2)
    assert out2.shape == (n2, f_out2 + f_in2)
    assert jnp.array_equal(out2[:, f_out2:], args2[0])
    assert jnp.allclose(out2, ref2, atol=2e-3, rtol=2e-3)

    # Case 3: tiny, feature-unaligned shapes (in-kernel concat store path).
    n3, f_in3, f_out3 = 64, 32, 48
    args3 = _make_inputs(k3, n3, f_in3, f_out3)
    out3 = jax.block_until_ready(run_f32(*args3))
    ref3 = _reference(*args3)
    assert out3.shape == (n3, f_out3 + f_in3)
    assert jnp.allclose(out3, ref3, atol=2e-3, rtol=2e-3)

    print("KERNEL_OK")
</pallas_src>

<mosaic_0001>
module attributes {stable_mosaic.version = 11 : i64} {
  func.func @_bn_stats_kernel(%arg0: i32, %arg1: i32, %arg2: memref<512x128xf32, #tpu.memory_space<vmem>>, %arg3: memref<1x2x8x128xf32, #tpu.memory_space<vmem>>) attributes {dimension_semantics = [#tpu.dimension_semantics<parallel>, #tpu.dimension_semantics<arbitrary>], iteration_bounds = array<i64: 2, 1>, scalar_prefetch = 0 : i64, scratch_operands = 0 : i64, tpu.core_type = #tpu.core_type<tc>, window_params = [{transform_indices = @transform_0, window_bounds = array<i64: 512, 128>}, {transform_indices = @transform_1, window_bounds = array<i64: 1, 2, 8, 128>}]} {
    %c0_i32 = arith.constant 0 : i32
    %0 = arith.cmpi eq, %arg1, %c0_i32 : i32
    %1 = arith.extui %0 : i1 to i32
    %c0_i32_0 = arith.constant 0 : i32
    %2 = arith.cmpi ne, %1, %c0_i32_0 : i32
    scf.if %2 {
      %cst_18 = arith.constant 0.000000e+00 : f32
      %20 = vector.broadcast %cst_18 : f32 to vector<2x8x128xf32>
      %c0_19 = arith.constant 0 : index
      %c0_20 = arith.constant 0 : index
      %c0_21 = arith.constant 0 : index
      %c0_22 = arith.constant 0 : index
      %21 = vector.load %arg3[%c0_19, %c0_20, %c0_21, %c0_22] : memref<1x2x8x128xf32, #tpu.memory_space<vmem>>, vector<1x2x8x128xf32>
      %22 = vector.shape_cast %21 : vector<1x2x8x128xf32> to vector<2x8x128xf32>
      %23 = vector.shape_cast %20 : vector<2x8x128xf32> to vector<1x2x8x128xf32>
      tpu.vector_store %arg3[%c0_19, %c0_20, %c0_21, %c0_22], %23 {strides = array<i32>} : memref<1x2x8x128xf32, #tpu.memory_space<vmem>>, vector<1x2x8x128xf32>,
    } else {
    }
    %c0 = arith.constant 0 : index
    %c0_1 = arith.constant 0 : index
    %3 = vector.load %arg2[%c0, %c0_1] : memref<512x128xf32, #tpu.memory_space<vmem>>, vector<512x128xf32>
    %4 = vector.shape_cast %3 : vector<512x128xf32> to vector<64x8x128xf32>
    %c0_2 = arith.constant 0 : index
    %c0_3 = arith.constant 0 : index
    %c0_4 = arith.constant 0 : index
    %c0_5 = arith.constant 0 : index
    %5 = vector.load %arg3[%c0_2, %c0_3, %c0_4, %c0_5] : memref<1x2x8x128xf32, #tpu.memory_space<vmem>>, vector<1x1x8x128xf32>
    %6 = vector.shape_cast %5 : vector<1x1x8x128xf32> to vector<8x128xf32>
    %cst = arith.constant dense<0.000000e+00> : vector<8x128xf32>
    %7 = vector.multi_reduction <add>, %4, %cst [0] : vector<64x8x128xf32> to vector<8x128xf32>
    %8 = arith.addf %6, %7 : vector<8x128xf32>
    %c0_6 = arith.constant 0 : index
    %c0_7 = arith.constant 0 : index
    %c0_8 = arith.constant 0 : index
    %c0_9 = arith.constant 0 : index
    %9 = vector.load %arg3[%c0_6, %c0_7, %c0_8, %c0_9] : memref<1x2x8x128xf32, #tpu.memory_space<vmem>>, vector<1x1x8x128xf32>
    %10 = vector.shape_cast %9 : vector<1x1x8x128xf32> to vector<8x128xf32>
    %11 = vector.shape_cast %8 : vector<8x128xf32> to vector<1x1x8x128xf32>
    tpu.vector_store %arg3[%c0_6, %c0_7, %c0_8, %c0_9], %11 {strides = array<i32>} : memref<1x2x8x128xf32, #tpu.memory_space<vmem>>, vector<1x1x8x128xf32>,
    %c0_10 = arith.constant 0 : index
    %c1 = arith.constant 1 : index
    %c0_11 = arith.constant 0 : index
    %c0_12 = arith.constant 0 : index
    %12 = vector.load %arg3[%c0_10, %c1, %c0_11, %c0_12] : memref<1x2x8x128xf32, #tpu.memory_space<vmem>>, vector<1x1x8x128xf32>
    %13 = vector.shape_cast %12 : vector<1x1x8x128xf32> to vector<8x128xf32>
    %14 = arith.mulf %4, %4 : vector<64x8x128xf32>
    %cst_13 = arith.constant dense<0.000000e+00> : vector<8x128xf32>
    %15 = vector.multi_reduction <add>, %14, %cst_13 [0] : vector<64x8x128xf32> to vector<8x128xf32>
    %16 = arith.addf %13, %15 : vector<8x128xf32>
    %c0_14 = arith.constant 0 : index
    %c1_15 = arith.constant 1 : index
    %c0_16 = arith.constant 0 : index
    %c0_17 = arith.constant 0 : index
    %17 = vector.load %arg3[%c0_14, %c1_15, %c0_16, %c0_17] : memref<1x2x8x128xf32, #tpu.memory_space<vmem>>, vector<1x1x8x128xf32>
    %18 = vector.shape_cast %17 : vector<1x1x8x128xf32> to vector<8x128xf32>
    %19 = vector.shape_cast %16 : vector<8x128xf32> to vector<1x1x8x128xf32>
    tpu.vector_store %arg3[%c0_14, %c1_15, %c0_16, %c0_17], %19 {strides = array<i32>} : memref<1x2x8x128xf32, #tpu.memory_space<vmem>>, vector<1x1x8x128xf32>,
    return
  }
  func.func @transform_0(%arg0: i32, %arg1: i32) -> (i32, i32) {
    %c1_i32 = arith.constant 1 : i32
    %0 = arith.muli %arg0, %c1_i32 : i32
    %1 = arith.addi %0, %arg1 : i32
    %c1_i32_0 = arith.constant 1 : i32
    %2 = arith.minsi %1, %c1_i32_0 : i32
    %c0_i32 = arith.constant 0 : i32
    %c0_i32_1 = arith.constant 0 : i32
    return %2, %c0_i32 : i32, i32
  }
  func.func @transform_1(%arg0: i32, %arg1: i32) -> (i32, i32, i32, i32) {
    %c0_i32 = arith.constant 0 : i32
    %c0_i32_0 = arith.constant 0 : i32
    %c0_i32_1 = arith.constant 0 : i32
    %c0_i32_2 = arith.constant 0 : i32
    return %arg0, %c0_i32, %c0_i32_0, %c0_i32_1 : i32, i32, i32, i32
  }
}

module attributes {stable_mosaic.version = 11 : i64} {
  func.func @_fused_kernel(%arg0: i32, %arg1: memref<512x128xf32, #tpu.memory_space<vmem>>, %arg2: memref<128x256xbf16, #tpu.memory_space<vmem>>, %arg3: memref<1x256xf32, #tpu.memory_space<vmem>>, %arg4: memref<512x384xf32, #tpu.memory_space<vmem>>) attributes {dimension_semantics = [#tpu.dimension_semantics<parallel>], iteration_bounds = array<i64: 2>, scalar_prefetch = 0 : i64, scratch_operands = 0 : i64, tpu.core_type = #tpu.core_type<tc>, window_params = [{transform_indices = @transform_0, window_bounds = array<i64: 512, 128>}, {pipeline_mode = #tpu.pipeline_mode<synchronous>, transform_indices = @transform_1, window_bounds = array<i64: 128, 256>}, {pipeline_mode = #tpu.pipeline_mode<synchronous>, transform_indices = @transform_2, window_bounds = array<i64: 1, 256>}, {transform_indices = @transform_3, window_bounds = array<i64: 512, 384>}]} {
    %c0 = arith.constant 0 : index
    %c0_0 = arith.constant 0 : index
    %0 = vector.load %arg1[%c0, %c0_0] : memref<512x128xf32, #tpu.memory_space<vmem>>, vector<512x128xf32>
    %1 = arith.truncf %0 : vector<512x128xf32> to vector<512x128xbf16>
    %c0_1 = arith.constant 0 : index
    %c0_2 = arith.constant 0 : index
    %2 = vector.load %arg2[%c0_1, %c0_2] : memref<128x256xbf16, #tpu.memory_space<vmem>>, vector<128x256xbf16>
    %cst = arith.constant dense<0.000000e+00> : vector<512x256xf32>
    %3 = tpu.matmul %1, %2, %cst {dimension_numbers = #tpu.dot_dimension_numbers<[1], [0], [0], [1], [0, 0, 1, 1], [], []>} : vector<512x128xbf16>, vector<128x256xbf16>, vector<512x256xf32> -> vector<512x256xf32>
    %c0_3 = arith.constant 0 : index
    %c0_4 = arith.constant 0 : index
    %4 = vector.load %arg3[%c0_3, %c0_4] : memref<1x256xf32, #tpu.memory_space<vmem>>, vector<1x256xf32>
    %5 = vector.broadcast %4 : vector<1x256xf32> to vector<512x256xf32>
    %6 = arith.addf %3, %5 : vector<512x256xf32>
    %cst_5 = arith.constant 0.000000e+00 : f32
    %7 = vector.broadcast %cst_5 : f32 to vector<512x256xf32>
    %8 = arith.maximumf %6, %7 : vector<512x256xf32>
    %c0_6 = arith.constant 0 : index
    %c0_7 = arith.constant 0 : index
    %9 = vector.load %arg4[%c0_6, %c0_7] : memref<512x384xf32, #tpu.memory_space<vmem>>, vector<512x256xf32>
    tpu.vector_store %arg4[%c0_6, %c0_7], %8 {strides = array<i32>} : memref<512x384xf32, #tpu.memory_space<vmem>>, vector<512x256xf32>,
    %c0_8 = arith.constant 0 : index
    %c256 = arith.constant 256 : index
    %10 = vector.load %arg4[%c0_8, %c256] : memref<512x384xf32, #tpu.memory_space<vmem>>, vector<512x128xf32>
    tpu.vector_store %arg4[%c0_8, %c256], %0 {strides = array<i32>} : memref<512x384xf32, #tpu.memory_space<vmem>>, vector<512x128xf32>,
    return
  }
  func.func @transform_0(%arg0: i32) -> (i32, i32) {
    %c0_i32 = arith.constant 0 : i32
    %c0_i32_0 = arith.constant 0 : i32
    return %arg0, %c0_i32 : i32, i32
  }
  func.func @transform_1(%arg0: i32) -> (i32, i32) {
    %c0_i32 = arith.constant 0 : i32
    %c0_i32_0 = arith.constant 0 : i32
    %c0_i32_1 = arith.constant 0 : i32
    return %c0_i32, %c0_i32_0 : i32, i32
  }
  func.func @transform_2(%arg0: i32) -> (i32, i32) {
    %c0_i32 = arith.constant 0 : i32
    %c0_i32_0 = arith.constant 0 : i32
    %c0_i32_1 = arith.constant 0 : i32
    return %c0_i32, %c0_i32_0 : i32, i32
  }
  func.func @transform_3(%arg0: i32) -> (i32, i32) {
    %c0_i32 = arith.constant 0 : i32
    %c0_i32_0 = arith.constant 0 : i32
    return %arg0, %c0_i32 : i32, i32
  }
}

</mosaic_0001>

<bundles_post_ra>
// kernel: residual_block_concat.2
= control target key start
LH: loop header
LB: loop body
LE: loop exit
PB: predicated region body
PF: predicated region fallthrough
CT: control target
= control target key end

     0   :  { %6 = vsyncpa [#allocation3], 0  ;;  %s859_s0 = inlined_call_operand.hbm [shape: f32[1024,128], index: 0, kind: input, shape index: {}]   ;;  %s860_s1 = inlined_call_operand.vmem [shape: f32[2,2,8,128], index: 1, kind: output, shape index: {}]  }
   0x1   :  { %8 = vsyncpa [#allocation3 + $0x1], 0  ;;  %s674_s6 = smov 0   ;;  %s676_s7 = smov 0  }
   0x2   :  { %s678_s8 = smov 0   ;;  %s680_s9 = smov 0  }
   0x3   :  { %s682_s10 = smov 0   ;;  %s684_s11 = smov 0  }
   0x4 LB: > { %s504_s12 = sadd.s32 4294967295, %s659_s11   ;;  %s26_s13 = sadd.s32 1, %s655_s10  ;;  %s659_s11 = sphi %s684_s11, %s14_s11   ;;  %s655_s10 = sphi %s682_s10, %s867_s10   ;;  %s651_s9 = sphi %s680_s9, %s866_s9   ;;  %s647_s8 = sphi %s678_s8, %s865_s8   ;;  %s643_s7 = sphi %s676_s7, %s864_s7   ;;  %s639_s6 = sphi %s674_s6, %s863_s6  }
   0x5   : > { %p28_p0 = scmp.ge.s32.totalorder %s26_s13, 2  ;;  %p31_p1 = scmp.lt.s32.totalorder %s655_s10, 1 }
   0x6   : > { %s39_s14 = sadd.s32 1, %s647_s8  ;;  %p46_p2 = scmp.ne.s32.totalorder %s647_s8, %s643_s7 }
   0x7   : > { %s869_s13 = smov (%p28_p0, %s26_s13), 0  ;;  %p47_p4 = scmp.eq.s32.totalorder %s659_s11, 0 }
   0x8   : > { %s32_s15 = scalar_select %p31_p1, %s655_s10, 1 }
   0x9   : > { %p34_p3 = scmp.lt.s32.totalorder %s869_s13, 1  ;;  %p52_p5 = scmp.ne.s32.totalorder %s643_s7, %s639_s6 }
   0xa   : > { %p53_p6 = scmp.eq.s32.totalorder %s504_s12, 0  ;;  %p48_p7 = por %p47_p4, %p46_p2 }
   0xb   : > { %s35_s16 = scalar_select %p34_p3, %s869_s13, 1 }
   0xc   : > { %p715_p8 = por %p53_p6, %p52_p5  ;;  %p527_p10 = scmp.lt.s32.totalorder %s659_s11, 2 }
   0xd   : > { %s36_s18 = ssub.s32 %s32_s15, %s35_s16  ;;  %s102_s19 = sand.u32 1, %s647_s8  }
   0xe   : > { %p37_p9 = scmp.eq.s32.totalorder %s36_s18, 0  ;;  %s519_s20 = sshll.u32 %s32_s15, 13 }
   0xf   : > { %s508_s22 = sshll.u32 %s102_s19, 9  ;;  %s727_s25 = scalar_lea.hbm %s859_s0, %s519_s20 }
  0x10   : > { %s722_s21 = scalar_select %p37_p9, %s647_s8, %s39_s14  }
  0x11   : > { %s106_s26 = scalar_lea.vmem [#allocation2], %s508_s22  ;;  %p729_p11 = pnand %p527_p10, %p48_p7 }
  0x12   : > { %s116_s27 = sshll.u32 %s106_s26, 4  ;;  %s735_s29 = scalar_lea.sflag [#allocation3], %s102_s19  ;;  %s733_s27 = int_to_ptr.vmem [resolvable:$true] %s116_s27 }
  0x13   : > { %s579_s30 = scalar_lea.hbm %s727_s25, 8192  ;;  %p581_p13 = pneg %p729_p11 }
  0x14   : > { %p580_p12 = scmp.ne.s32.totalorder %s727_s25, %s579_s30  ;;  %s584_s4 = scalar_lea.hbm %s859_s0, 16384 }
  0x15   : > { %p585_p2 = scmp.lt.u32.totalorder %s727_s25, %s859_s0  ;;  %p586_p3 = scmp.lt.u32.totalorder %s584_s4, %s579_s30 }
  0x16   : > { %p582_p0 = pnand %p581_p13, %p580_p12  ;;  %p588_p5 = scmp.lt.u32.totalorder %s579_s30, %s727_s25 }
  0x17   : > { %p587_p4 = por %p586_p3, %p585_p2 }
  0x18   : > { %p583_p1 = pneg %p582_p0 }
  0x19   : > { %p589_p6 = por %p588_p5, %p587_p4 }
  0x1b   : > { %p590_p7 = pnand %p589_p6, %p583_p1 }
  0x1d   : > { %593 = shalt.err (!%p590_p7)
}
  0x1e   : > { %s594_s12 = scalar_lea.vmem %s733_s27, 8192  ;;  %s661_s14 = smov [#allocation2]  }
  0x1f   : > { %p595_p9 = scmp.ne.s32.totalorder %s733_s27, %s594_s12  ;;  %s599_s15 = sshll.u32 %s661_s14, 4  ;;  %s600_s15 = int_to_ptr.vmem [resolvable:$false] %s599_s15 }
  0x20   : > { %s601_s16 = scalar_lea.vmem %s600_s15, 16384  ;;  %p602_p0 = scmp.lt.s32.totalorder %s733_s27, %s600_s15 }
  0x21   : > { %p597_p10 = pnand %p595_p9, %p581_p13  ;;  %p603_p2 = scmp.lt.s32.totalorder %s601_s16, %s594_s12 }
  0x23   : > { %p598_p12 = pneg %p597_p10  ;;  %p604_p3 = por %p603_p2, %p602_p0 }
  0x25   : > { %p605_p4 = pnand %p604_p3, %p598_p12 }
  0x27   : > { %608 = shalt.err (!%p605_p4)
}
  0x28   : > { %s662_s18 = smov 128   ;;  %s663_s19 = smov 8  }
  0x29   : > { %526 = dma.hbm_to_vmem [thread:$0]  (!%p729_p11), %s727_s25, 8192, %s733_s27, %s735_s29, %s662_s18, %s662_s18, %s663_s19  }
  0x2a   : > { %p511_p13 = scmp.ge.s32.totalorder %s659_s11, 1  ;;  %p124_p1 = scmp.lt.s32.totalorder %s659_s11, 3 }
  0x2c   : > { %p125_p5 = pnand %p511_p13, %p124_p1 }
  0x2d   : > { %s130_s20 = sand.u32 (!%p125_p5), 1, %s643_s7  }
  0x2e   : > { %128 = sbr.rel (%p125_p5) target bundleno = 184 (0xb8), region = 24  ;;  %s512_s22 = sshll.u32 (!%p125_p5), %s130_s20, 9 }
  0x2f   : > { %s131_s23 = scalar_lea.sflag (!%p125_p5), [#allocation3], %s130_s20  ;;  %s766_s24 = scalar_lea.vmem (!%p125_p5), [#allocation2], %s512_s22 }
  0x35   : > { %634 = dma.done.wait (%p715_p8), %s131_s23, 8192  }
  0x36   : > { %636 = vsyncadd (%p715_p8), %s131_s23, 4294959104  ;;  %v168_v0 = vld [vmem:[%s766_s24] sm:$0xff]  ;;  %v169_v1 = vld [vmem:[%s766_s24 + $0x8] sm:$0xff]  ;;  %p157_p8 = scmp.lt.s32.totalorder %s651_s9, 1 }
  0x37   : > { %v170_v2 = vld [vmem:[%s766_s24 + $0x10] sm:$0xff]  ;;  %v171_v3 = vld [vmem:[%s766_s24 + $0x18] sm:$0xff]  ;;  %v233_v4 = vadd.f32 %v169_v1, %v168_v0  ;;  %v300_v5 = vmul.f32 %v168_v0, %v168_v0  ;;  %v301_v6 = vmul.f32 %v169_v1, %v169_v1  ;;  %v172_v8 = vld [vmem:[%s766_s24 + $0x20] sm:$0xff] }
  0x38   : > { %v302_v7 = vmul.f32 %v170_v2, %v170_v2  ;;  %v303_v10 = vmul.f32 %v171_v3, %v171_v3  ;;  %v173_v12 = vld [vmem:[%s766_s24 + $0x28] sm:$0xff]  ;;  %v304_v14 = vmul.f32 %v172_v8, %v172_v8  ;;  %v174_v16 = vld [vmem:[%s766_s24 + $0x30] sm:$0xff]  ;;  %v175_v20 = vld [vmem:[%s766_s24 + $0x38] sm:$0xff]  ;;  %s871_s9 = smov (!%p157_p8, %s651_s9), 1 }
  0x39   : > { %v234_v9 = vadd.f32 %v233_v4, %v170_v2  ;;  %v364_v11 = vadd.f32 %v301_v6, %v300_v5  ;;  %v305_v18 = vmul.f32 %v173_v12, %v173_v12  ;;  %v306_v22 = vmul.f32 %v174_v16, %v174_v16  ;;  %v176_v24 = vld [vmem:[%s766_s24 + $0x40] sm:$0xff]  ;;  %v177_v28 = vld [vmem:[%s766_s24 + $0x48] sm:$0xff]  ;;  %v178_v32 = vld [vmem:[%s766_s24 + $0x50] sm:$0xff]  ;;  %s520_s17 = sshll.u32 %s871_s9, 4 }
  0x3a   : > { %v307_v26 = vmul.f32 %v175_v20, %v175_v20  ;;  %v308_v30 = vmul.f32 %v176_v24, %v176_v24  ;;  %v309_v34 = vmul.f32 %v177_v28, %v177_v28  ;;  %v179_v36 = vld [vmem:[%s766_s24 + $0x58] sm:$0xff]  ;;  %v310_v38 = vmul.f32 %v178_v32, %v178_v32  ;;  %v180_v40 = vld [vmem:[%s766_s24 + $0x60] sm:$0xff]  ;;  %v181_v44 = vld [vmem:[%s766_s24 + $0x68] sm:$0xff]  ;;  %s161_s27 = scalar_lea.vmem %s860_s1, %s520_s17 }
  0x3b   : > { %v235_v13 = vadd.f32 %v234_v9, %v171_v3  ;;  %v365_v15 = vadd.f32 %v364_v11, %v302_v7  ;;  %v311_v42 = vmul.f32 %v179_v36, %v179_v36  ;;  %v312_v46 = vmul.f32 %v180_v40, %v180_v40  ;;  %v182_v48 = vld [vmem:[%s766_s24 + $0x70] sm:$0xff]  ;;  %v183_v52 = vld [vmem:[%s766_s24 + $0x78] sm:$0xff]  ;;  %v184_v56 = vld [vmem:[%s766_s24 + $0x80] sm:$0xff] }
  0x3c   : > { %v313_v50 = vmul.f32 %v181_v44, %v181_v44  ;;  %v314_v54 = vmul.f32 %v182_v48, %v182_v48  ;;  %v315_v58 = vmul.f32 %v183_v52, %v183_v52  ;;  %v185_v60 = vld [vmem:[%s766_s24 + $0x88] sm:$0xff]  ;;  %v316_v62 = vmul.f32 %v184_v56, %v184_v56  ;;  %v186_v0 = vld [vmem:[%s766_s24 + $0x90] sm:$0xff]  ;;  %v187_v4 = vld [vmem:[%s766_s24 + $0x98] sm:$0xff] }
  0x3d   : > { %v236_v17 = vadd.f32 %v235_v13, %v172_v8  ;;  %v366_v19 = vadd.f32 %v365_v15, %v303_v10  ;;  %v317_v2 = vmul.f32 %v185_v60, %v185_v60  ;;  %v318_v6 = vmul.f32 %v186_v0, %v186_v0  ;;  %v188_v8 = vld [vmem:[%s766_s24 + $0xa0] sm:$0xff] }
  0x3e   : > { %v319_v10 = vmul.f32 %v187_v4, %v187_v4 }
  0x3f   : > { %v237_v21 = vadd.f32 %v236_v17, %v173_v12  ;;  %v367_v23 = vadd.f32 %v366_v19, %v304_v14  ;;  %v189_v12 = vld [vmem:[%s766_s24 + $0xa8] sm:$0xff]  ;;  %v320_v14 = vmul.f32 %v188_v8, %v188_v8 }
  0x41   : > { %v238_v25 = vadd.f32 %v237_v21, %v174_v16  ;;  %v368_v27 = vadd.f32 %v367_v23, %v305_v18  ;;  %v190_v16 = vld [vmem:[%s766_s24 + $0xb0] sm:$0xff]  ;;  %v321_v18 = vmul.f32 %v189_v12, %v189_v12 }
  0x43   : > { %v239_v29 = vadd.f32 %v238_v25, %v175_v20  ;;  %v369_v31 = vadd.f32 %v368_v27, %v306_v22  ;;  %v191_v20 = vld [vmem:[%s766_s24 + $0xb8] sm:$0xff]  ;;  %v322_v22 = vmul.f32 %v190_v16, %v190_v16 }
  0x45   : > { %v240_v33 = vadd.f32 %v239_v29, %v176_v24  ;;  %v370_v35 = vadd.f32 %v369_v31, %v307_v26  ;;  %v192_v24 = vld [vmem:[%s766_s24 + $0xc0] sm:$0xff]  ;;  %v323_v26 = vmul.f32 %v191_v20, %v191_v20 }
  0x47   : > { %v241_v37 = vadd.f32 %v240_v33, %v177_v28  ;;  %v371_v39 = vadd.f32 %v370_v35, %v308_v30  ;;  %v193_v28 = vld [vmem:[%s766_s24 + $0xc8] sm:$0xff]  ;;  %v324_v30 = vmul.f32 %v192_v24, %v192_v24 }
  0x49   : > { %v242_v41 = vadd.f32 %v241_v37, %v178_v32  ;;  %v372_v43 = vadd.f32 %v371_v39, %v309_v34  ;;  %v194_v32 = vld [vmem:[%s766_s24 + $0xd0] sm:$0xff]  ;;  %v325_v34 = vmul.f32 %v193_v28, %v193_v28 }
  0x4b   : > { %v243_v45 = vadd.f32 %v242_v41, %v179_v36  ;;  %v373_v47 = vadd.f32 %v372_v43, %v310_v38  ;;  %v195_v36 = vld [vmem:[%s766_s24 + $0xd8] sm:$0xff]  ;;  %v326_v38 = vmul.f32 %v194_v32, %v194_v32 }
  0x4d   : > { %v244_v49 = vadd.f32 %v243_v45, %v180_v40  ;;  %v374_v51 = vadd.f32 %v373_v47, %v311_v42  ;;  %v196_v40 = vld [vmem:[%s766_s24 + $0xe0] sm:$0xff]  ;;  %v327_v42 = vmul.f32 %v195_v36, %v195_v36 }
  0x4f   : > { %v245_v53 = vadd.f32 %v244_v49, %v181_v44  ;;  %v375_v55 = vadd.f32 %v374_v51, %v312_v46  ;;  %v197_v44 = vld [vmem:[%s766_s24 + $0xe8] sm:$0xff]  ;;  %v328_v46 = vmul.f32 %v196_v40, %v196_v40 }
  0x51   : > { %v246_v57 = vadd.f32 %v245_v53, %v182_v48  ;;  %v376_v59 = vadd.f32 %v375_v55, %v313_v50  ;;  %v198_v48 = vld [vmem:[%s766_s24 + $0xf0] sm:$0xff]  ;;  %v329_v50 = vmul.f32 %v197_v44, %v197_v44 }
  0x53   : > { %v247_v61 = vadd.f32 %v246_v57, %v183_v52  ;;  %v377_v63 = vadd.f32 %v376_v59, %v314_v54  ;;  %v199_v52 = vld [vmem:[%s766_s24 + $0xf8] sm:$0xff]  ;;  %v330_v54 = vmul.f32 %v198_v48, %v198_v48 }
  0x55   : > { %v248_v1 = vadd.f32 %v247_v61, %v184_v56  ;;  %v378_v3 = vadd.f32 %v377_v63, %v315_v58  ;;  %v200_v56 = vld [vmem:[%s766_s24 + $0x100] sm:$0xff]  ;;  %v331_v58 = vmul.f32 %v199_v52, %v199_v52 }
  0x57   : > { %v249_v5 = vadd.f32 %v248_v1, %v185_v60  ;;  %v379_v7 = vadd.f32 %v378_v3, %v316_v62  ;;  %v201_v60 = vld [vmem:[%s766_s24 + $0x108] sm:$0xff]  ;;  %v332_v62 = vmul.f32 %v200_v56, %v200_v56 }
  0x59   : > { %v250_v9 = vadd.f32 %v249_v5, %v186_v0  ;;  %v380_v11 = vadd.f32 %v379_v7, %v317_v2  ;;  %v202_v0 = vld [vmem:[%s766_s24 + $0x110] sm:$0xff]  ;;  %v333_v2 = vmul.f32 %v201_v60, %v201_v60 }
  0x5b   : > { %v251_v13 = vadd.f32 %v250_v9, %v187_v4  ;;  %v381_v15 = vadd.f32 %v380_v11, %v318_v6  ;;  %v203_v4 = vld [vmem:[%s766_s24 + $0x118] sm:$0xff]  ;;  %v334_v6 = vmul.f32 %v202_v0, %v202_v0 }
  0x5d   : > { %v252_v17 = vadd.f32 %v251_v13, %v188_v8  ;;  %v382_v19 = vadd.f32 %v381_v15, %v319_v10  ;;  %v204_v8 = vld [vmem:[%s766_s24 + $0x120] sm:$0xff]  ;;  %v335_v10 = vmul.f32 %v203_v4, %v203_v4 }
  0x5f   : > { %v253_v21 = vadd.f32 %v252_v17, %v189_v12  ;;  %v383_v23 = vadd.f32 %v382_v19, %v320_v14  ;;  %v205_v12 = vld [vmem:[%s766_s24 + $0x128] sm:$0xff]  ;;  %v336_v14 = vmul.f32 %v204_v8, %v204_v8 }
  0x61   : > { %v254_v25 = vadd.f32 %v253_v21, %v190_v16  ;;  %v384_v27 = vadd.f32 %v383_v23, %v321_v18  ;;  %v206_v16 = vld [vmem:[%s766_s24 + $0x130] sm:$0xff]  ;;  %v337_v18 = vmul.f32 %v205_v12, %v205_v12 }
  0x63   : > { %v255_v29 = vadd.f32 %v254_v25, %v191_v20  ;;  %v385_v31 = vadd.f32 %v384_v27, %v322_v22  ;;  %v207_v20 = vld [vmem:[%s766_s24 + $0x138] sm:$0xff]  ;;  %v338_v22 = vmul.f32 %v206_v16, %v206_v16 }
  0x65   : > { %v256_v33 = vadd.f32 %v255_v29, %v192_v24  ;;  %v386_v35 = vadd.f32 %v385_v31, %v323_v26  ;;  %v208_v24 = vld [vmem:[%s766_s24 + $0x140] sm:$0xff]  ;;  %v339_v26 = vmul.f32 %v207_v20, %v207_v20 }
  0x67   : > { %v257_v37 = vadd.f32 %v256_v33, %v193_v28  ;;  %v387_v39 = vadd.f32 %v386_v35, %v324_v30  ;;  %v209_v28 = vld [vmem:[%s766_s24 + $0x148] sm:$0xff]  ;;  %v340_v30 = vmul.f32 %v208_v24, %v208_v24 }
  0x69   : > { %v258_v41 = vadd.f32 %v257_v37, %v194_v32  ;;  %v388_v43 = vadd.f32 %v387_v39, %v325_v34  ;;  %v210_v32 = vld [vmem:[%s766_s24 + $0x150] sm:$0xff]  ;;  %v341_v34 = vmul.f32 %v209_v28, %v209_v28 }
  0x6b   : > { %v259_v45 = vadd.f32 %v258_v41, %v195_v36  ;;  %v389_v47 = vadd.f32 %v388_v43, %v326_v38  ;;  %v211_v36 = vld [vmem:[%s766_s24 + $0x158] sm:$0xff]  ;;  %v342_v38 = vmul.f32 %v210_v32, %v210_v32 }
  0x6d   : > { %v260_v49 = vadd.f32 %v259_v45, %v196_v40  ;;  %v390_v51 = vadd.f32 %v389_v47, %v327_v42  ;;  %v212_v40 = vld [vmem:[%s766_s24 + $0x160] sm:$0xff]  ;;  %v343_v42 = vmul.f32 %v211_v36, %v211_v36 }
  0x6f   : > { %v261_v53 = vadd.f32 %v260_v49, %v197_v44  ;;  %v391_v55 = vadd.f32 %v390_v51, %v328_v46  ;;  %v213_v44 = vld [vmem:[%s766_s24 + $0x168] sm:$0xff]  ;;  %v344_v46 = vmul.f32 %v212_v40, %v212_v40 }
  0x71   : > { %v262_v57 = vadd.f32 %v261_v53, %v198_v48  ;;  %v392_v59 = vadd.f32 %v391_v55, %v329_v50  ;;  %v214_v48 = vld [vmem:[%s766_s24 + $0x170] sm:$0xff]  ;;  %v345_v50 = vmul.f32 %v213_v44, %v213_v44 }
  0x73   : > { %v263_v61 = vadd.f32 %v262_v57, %v199_v52  ;;  %v393_v63 = vadd.f32 %v392_v59, %v330_v54  ;;  %v215_v52 = vld [vmem:[%s766_s24 + $0x178] sm:$0xff]  ;;  %v346_v54 = vmul.f32 %v214_v48, %v214_v48 }
  0x75   : > { %v264_v1 = vadd.f32 %v263_v61, %v200_v56  ;;  %v394_v3 = vadd.f32 %v393_v63, %v331_v58  ;;  %v216_v56 = vld [vmem:[%s766_s24 + $0x180] sm:$0xff]  ;;  %v347_v58 = vmul.f32 %v215_v52, %v215_v52 }
  0x77   : > { %v265_v5 = vadd.f32 %v264_v1, %v201_v60  ;;  %v395_v7 = vadd.f32 %v394_v3, %v332_v62  ;;  %v217_v60 = vld [vmem:[%s766_s24 + $0x188] sm:$0xff]  ;;  %v348_v62 = vmul.f32 %v216_v56, %v216_v56 }
  0x79   : > { %v266_v9 = vadd.f32 %v265_v5, %v202_v0  ;;  %v396_v11 = vadd.f32 %v395_v7, %v333_v2  ;;  %v218_v0 = vld [vmem:[%s766_s24 + $0x190] sm:$0xff]  ;;  %v349_v2 = vmul.f32 %v217_v60, %v217_v60 }
  0x7b   : > { %v267_v13 = vadd.f32 %v266_v9, %v203_v4  ;;  %v397_v15 = vadd.f32 %v396_v11, %v334_v6  ;;  %v219_v4 = vld [vmem:[%s766_s24 + $0x198] sm:$0xff]  ;;  %v350_v6 = vmul.f32 %v218_v0, %v218_v0 }
  0x7d   : > { %v268_v17 = vadd.f32 %v267_v13, %v204_v8  ;;  %v398_v19 = vadd.f32 %v397_v15, %v335_v10  ;;  %v220_v8 = vld [vmem:[%s766_s24 + $0x1a0] sm:$0xff]  ;;  %v351_v10 = vmul.f32 %v219_v4, %v219_v4 }
  0x7f   : > { %v269_v21 = vadd.f32 %v268_v17, %v205_v12  ;;  %v399_v23 = vadd.f32 %v398_v19, %v336_v14  ;;  %v221_v12 = vld [vmem:[%s766_s24 + $0x1a8] sm:$0xff]  ;;  %v352_v14 = vmul.f32 %v220_v8, %v220_v8 }
  0x81   : > { %v270_v25 = vadd.f32 %v269_v21, %v206_v16  ;;  %v400_v27 = vadd.f32 %v399_v23, %v337_v18  ;;  %v222_v16 = vld [vmem:[%s766_s24 + $0x1b0] sm:$0xff]  ;;  %v353_v18 = vmul.f32 %v221_v12, %v221_v12 }
  0x83   : > { %v271_v29 = vadd.f32 %v270_v25, %v207_v20  ;;  %v401_v31 = vadd.f32 %v400_v27, %v338_v22  ;;  %v223_v20 = vld [vmem:[%s766_s24 + $0x1b8] sm:$0xff]  ;;  %v354_v22 = vmul.f32 %v222_v16, %v222_v16 }
  0x85   : > { %v272_v33 = vadd.f32 %v271_v29, %v208_v24  ;;  %v402_v35 = vadd.f32 %v401_v31, %v339_v26  ;;  %v224_v24 = vld [vmem:[%s766_s24 + $0x1c0] sm:$0xff]  ;;  %v355_v26 = vmul.f32 %v223_v20, %v223_v20 }
  0x87   : > { %v273_v37 = vadd.f32 %v272_v33, %v209_v28  ;;  %v403_v39 = vadd.f32 %v402_v35, %v340_v30  ;;  %v225_v28 = vld [vmem:[%s766_s24 + $0x1c8] sm:$0xff]  ;;  %v356_v30 = vmul.f32 %v224_v24, %v224_v24 }
  0x89   : > { %v274_v41 = vadd.f32 %v273_v37, %v210_v32  ;;  %v404_v43 = vadd.f32 %v403_v39, %v341_v34  ;;  %v226_v32 = vld [vmem:[%s766_s24 + $0x1d0] sm:$0xff]  ;;  %v357_v34 = vmul.f32 %v225_v28, %v225_v28 }
  0x8b   : > { %v275_v45 = vadd.f32 %v274_v41, %v211_v36  ;;  %v405_v47 = vadd.f32 %v404_v43, %v342_v38  ;;  %v227_v36 = vld [vmem:[%s766_s24 + $0x1d8] sm:$0xff]  ;;  %v358_v38 = vmul.f32 %v226_v32, %v226_v32 }
  0x8d   : > { %v276_v49 = vadd.f32 %v275_v45, %v212_v40  ;;  %v406_v51 = vadd.f32 %v405_v47, %v343_v42  ;;  %v228_v40 = vld [vmem:[%s766_s24 + $0x1e0] sm:$0xff]  ;;  %v359_v42 = vmul.f32 %v227_v36, %v227_v36 }
  0x8f   : > { %v277_v53 = vadd.f32 %v276_v49, %v213_v44  ;;  %v407_v55 = vadd.f32 %v406_v51, %v344_v46  ;;  %v229_v44 = vld [vmem:[%s766_s24 + $0x1e8] sm:$0xff]  ;;  %v360_v46 = vmul.f32 %v228_v40, %v228_v40 }
  0x91   : > { %v278_v57 = vadd.f32 %v277_v53, %v214_v48  ;;  %v408_v59 = vadd.f32 %v407_v55, %v345_v50  ;;  %v230_v48 = vld [vmem:[%s766_s24 + $0x1f0] sm:$0xff]  ;;  %v361_v50 = vmul.f32 %v229_v44, %v229_v44 }
  0x93   : > { %v279_v61 = vadd.f32 %v278_v57, %v215_v52  ;;  %v409_v63 = vadd.f32 %v408_v59, %v346_v54  ;;  %v231_v52 = vld [vmem:[%s766_s24 + $0x1f8] sm:$0xff]  ;;  %v362_v54 = vmul.f32 %v230_v48, %v230_v48 }
  0x94   : > { %v363_v57 = vmul.f32 %v231_v52, %v231_v52 }
  0x95   : > { %v280_v1 = vadd.f32 %v279_v61, %v216_v56  ;;  %v410_v3 = vadd.f32 %v409_v63, %v347_v58 }
  0x97   : > { %v281_v5 = vadd.f32 %v280_v1, %v217_v60  ;;  %v411_v7 = vadd.f32 %v410_v3, %v348_v62 }
  0x99   : > { %v282_v9 = vadd.f32 %v281_v5, %v218_v0  ;;  %v412_v11 = vadd.f32 %v411_v7, %v349_v2 }
  0x9b   : > { %v283_v13 = vadd.f32 %v282_v9, %v219_v4  ;;  %v413_v15 = vadd.f32 %v412_v11, %v350_v6 }
  0x9d   : > { %v284_v17 = vadd.f32 %v283_v13, %v220_v8  ;;  %v414_v19 = vadd.f32 %v413_v15, %v351_v10 }
  0x9f   : > { %v285_v21 = vadd.f32 %v284_v17, %v221_v12  ;;  %v415_v23 = vadd.f32 %v414_v19, %v352_v14 }
  0xa1   : > { %v286_v25 = vadd.f32 %v285_v21, %v222_v16  ;;  %v416_v27 = vadd.f32 %v415_v23, %v353_v18 }
  0xa3   : > { %v287_v29 = vadd.f32 %v286_v25, %v223_v20  ;;  %v417_v31 = vadd.f32 %v416_v27, %v354_v22 }
  0xa5   : > { %v288_v33 = vadd.f32 %v287_v29, %v224_v24  ;;  %v418_v35 = vadd.f32 %v417_v31, %v355_v26 }
  0xa7   : > { %v289_v37 = vadd.f32 %v288_v33, %v225_v28  ;;  %v419_v39 = vadd.f32 %v418_v35, %v356_v30 }
  0xa9   : > { %v290_v41 = vadd.f32 %v289_v37, %v226_v32  ;;  %v420_v43 = vadd.f32 %v419_v39, %v357_v34 }
  0xab   : > { %v291_v45 = vadd.f32 %v290_v41, %v227_v36  ;;  %v421_v47 = vadd.f32 %v420_v43, %v358_v38 }
  0xad   : > { %v292_v49 = vadd.f32 %v291_v45, %v228_v40  ;;  %v422_v51 = vadd.f32 %v421_v47, %v359_v42 }
  0xaf   : > { %v293_v53 = vadd.f32 %v292_v49, %v229_v44  ;;  %v423_v55 = vadd.f32 %v422_v51, %v360_v46 }
  0xb1   : > { %v294_v56 = vadd.f32 %v293_v53, %v230_v48  ;;  %v424_v58 = vadd.f32 %v423_v55, %v361_v50 }
  0xb3   : > { %v295_v59 = vadd.f32 %v294_v56, %v231_v52  ;;  %v425_v60 = vadd.f32 %v424_v58, %v362_v54 }
  0xb5   : > { %v426_v61 = vadd.f32 %v425_v60, %v363_v57  ;;  %297 = vst [vmem:[%s161_s27] sm:$0xff] %v295_v59 }
  0xb7   : > { %516 = vst [vmem:[%s161_s27 + $0x8] sm:$0xff] %v426_v61 }
  0xb8 PF: > { %s14_s11 = sadd.s32 1, %s659_s11   ;;  %s863_s6 = smov %s643_s7 }
  0xb9   : > { %p11_p11 = scmp.ge.s32.totalorder %s14_s11, 4   ;;  %s864_s7 = smov %s647_s8 }
  0xba   : > { %s865_s8 = smov %s722_s21  ;;  %s866_s9 = smov %s655_s10 }
  0xbb   : > { %s867_s10 = smov %s869_s13  ;;  %13 = sbr.rel (!%p11_p11) target bundleno = 4 (0x4), region = 69 }
  0xc2   :  { %450 = vsyncpa [#allocation3], 1 }
  0xc3   :  { %452 = vsyncpa [#allocation3 + $0x1], 1 }

// kernel: residual_block_concat.3
= control target key start
LH: loop header
LB: loop body
LE: loop exit
PB: predicated region body
PF: predicated region fallthrough
CT: control target
= control target key end

     0   :  { %8 = vsyncpa [#allocation3], 0  ;;  %s2354_s0 = inlined_call_operand.hbm [shape: f32[1024,128], index: 0, kind: input, shape index: {}]   ;;  %s2355_s1 = inlined_call_operand.vmem [shape: bf16[128,256], index: 1, kind: input, shape index: {}]   ;;  %s2356_s2 = inlined_call_operand.vmem [shape: f32[1,256], index: 2, kind: input, shape index: {}]   ;;  %s2357_s3 = inlined_call_operand.hbm [shape: f32[1024,384], index: 3, kind: output, shape index: {}]  }
   0x1   :  { %10 = vsyncpa [#allocation3 + $0x1], 0 }
   0x2   :  { %11 = vsyncpa [#allocation4], 0 }
   0x3   :  { %13 = vsyncpa [#allocation4 + $0x1], 0  ;;  %s1405_s12 = smov 0   ;;  %s1407_s13 = smov 0  }
   0x4   :  { %s1409_s14 = smov 0   ;;  %s1411_s15 = smov 0  }
   0x5 LB: > { %s1426_s16 = sadd.s32 4294967295, %s1376_s15   ;;  %s1157_s17 = sadd.s32 4294967294, %s1376_s15   ;;  %s1376_s15 = sphi %s1411_s15, %s2396_s15   ;;  %s1372_s14 = sphi %s1409_s14, %s2395_s14   ;;  %s1368_s13 = sphi %s1407_s13, %s2394_s13   ;;  %s1364_s12 = sphi %s1405_s12, %s2393_s12  }
   0x6   : > { %s1430_s18 = sadd.s32 1, %s1376_s15   ;;  %s26_s19 = sadd.s32 1, %s1372_s14 }
   0x7   : > { %s23_s20 = ssub.s32 %s1376_s15, %s1430_s18  ;;  %p33_p0 = scmp.ne.s32.totalorder %s1372_s14, %s1368_s13 }
   0x8   : > { %p24_p1 = scmp.eq.s32.totalorder %s23_s20, 0  ;;  %p34_p2 = scmp.eq.s32.totalorder %s1376_s15, 0 }
   0x9   : > { %p39_p3 = scmp.ne.s32.totalorder %s1368_s13, %s1364_s12  ;;  %p40_p4 = scmp.eq.s32.totalorder %s1426_s16, 0 }
   0xa   : > { %s1442_s21 = scalar_select %p24_p1, %s1372_s14, %s26_s19  }
   0xb   : > { %p1444_p5 = por %p34_p2, %p33_p0  ;;  %p1448_p6 = por %p40_p4, %p39_p3 }
   0xc   : > { %p105_p7 = scmp.eq.s32.totalorder %s1426_s16, 1  ;;  %p111_p8 = scmp.eq.s32.totalorder %s1157_s17, 1 }
   0xd   : > { %p1217_p10 = scmp.lt.s32.totalorder %s1376_s15, 2  ;;  %s137_s26 = sand.u32 1, %s1372_s14  }
   0xe   : > { %p1455_p11 = por %p105_p7, %p33_p0  ;;  %p1459_p12 = por %p111_p8, %p39_p3 }
   0xf   : > { %s1186_s27 = sshll.u32 %s1376_s15, 13  ;;  %s1160_s28 = sshll.u32 %s137_s26, 9 }
  0x10   : > { %s2365_s24 = scalar_select %p1455_p11, 1, 0 }
  0x11   : > { %s2366_s25 = scalar_select %p1459_p12, 1, 0 }
  0x12   : > { %s1468_s4 = scalar_lea.hbm %s2354_s0, %s1186_s27  ;;  %s141_s5 = scalar_lea.vmem [#allocation2], %s1160_s28 }
  0x13   : > { %s148_s6 = sshll.u32 %s141_s5, 4  ;;  %p1472_p13 = pnand %p1217_p10, %p1444_p5  ;;  %s1476_s6 = int_to_ptr.vmem [resolvable:$true] %s148_s6 }
  0x14   : > { %s1478_s8 = scalar_lea.sflag [#allocation3], %s137_s26  ;;  %s1280_s9 = scalar_lea.hbm %s1468_s4, 8192 }
  0x15   : > { %p1281_p0 = scmp.ne.s32.totalorder %s1468_s4, %s1280_s9  ;;  %p1282_p1 = pneg %p1472_p13 }
  0x16   : > { %s1285_s17 = scalar_lea.hbm %s2354_s0, 16384  ;;  %p1286_p4 = scmp.lt.u32.totalorder %s1468_s4, %s2354_s0 }
  0x17   : > { %p1283_p2 = pnand %p1282_p1, %p1281_p0  ;;  %p1287_p5 = scmp.lt.u32.totalorder %s1285_s17, %s1280_s9 }
  0x18   : > { %p1289_p8 = scmp.lt.u32.totalorder %s1280_s9, %s1468_s4 }
  0x19   : > { %p1284_p3 = pneg %p1283_p2  ;;  %p1288_p7 = por %p1287_p5, %p1286_p4 }
  0x1b   : > { %p1290_p10 = por %p1289_p8, %p1288_p7 }
  0x1d   : > { %p1291_p9 = pnand %p1290_p10, %p1284_p3 }
  0x1f   : > { %1294 = shalt.err (!%p1291_p9)
}
  0x20   : > { %s1295_s22 = scalar_lea.vmem %s1476_s6, 8192  ;;  %s1378_s26 = smov [#allocation2]  }
  0x21   : > { %p1296_p0 = scmp.ne.s32.totalorder %s1476_s6, %s1295_s22  ;;  %s1300_s27 = sshll.u32 %s1378_s26, 4  ;;  %s1301_s27 = int_to_ptr.vmem [resolvable:$false] %s1300_s27 }
  0x22   : > { %s1302_s28 = scalar_lea.vmem %s1301_s27, 16384  ;;  %p1303_p11 = scmp.lt.s32.totalorder %s1476_s6, %s1301_s27 }
  0x23   : > { %p1298_p2 = pnand %p1296_p0, %p1282_p1  ;;  %p1304_p4 = scmp.lt.s32.totalorder %s1302_s28, %s1295_s22 }
  0x25   : > { %p1299_p12 = pneg %p1298_p2  ;;  %p1305_p5 = por %p1304_p4, %p1303_p11 }
  0x27   : > { %p1306_p7 = pnand %p1305_p5, %p1299_p12 }
  0x29   : > { %1309 = shalt.err (!%p1306_p7)
}
  0x2a   : > { %s1379_s29 = smov 128   ;;  %s1380_s30 = smov 8  }
  0x2b   : > { %1212 = dma.hbm_to_vmem [thread:$0]  (!%p1472_p13), %s1468_s4, 8192, %s1476_s6, %s1478_s8, %s1379_s29, %s1379_s29, %s1380_s30  }
  0x2c   : > { %p1163_p9 = scmp.ge.s32.totalorder %s1376_s15, 1  ;;  %p156_p1 = scmp.lt.s32.totalorder %s1376_s15, 3 }
  0x2e   : > { %p157_p3 = pnand %p1163_p9, %p156_p1 }
  0x30   : > { %160 = sbr.rel (%p157_p3) target bundleno = 447 (0x1bf), region = 32 }
  0x37   : > { %s1509_s5 = sand.u32 1, %s1368_s13  }
  0x38   : > { %s1164_s9 = sshll.u32 %s1509_s5, 9  ;;  %s163_s10 = scalar_lea.sflag [#allocation3], %s1509_s5 }
  0x39   : > { %s1513_s11 = scalar_lea.vmem [#allocation2], %s1164_s9 }
  0x3a   : > { %1355 = dma.done.wait (%p1448_p6), %s163_s10, 8192  }
  0x3b   : > { %1357 = vsyncadd (%p1448_p6), %s163_s10, 4294959104  ;;  %v2359_v0 = vmov 0   ;;  %v1256_v1 = vld [vmem:[%s2355_s1 + $0x4] ss:$8 sps:$4 sm:$0xff]   ;;  %v1258_v2 = vld [vmem:[%s2355_s1] ss:$8 sps:$4 sm:$0xff]  }
  0x3c   : > { %428 = vmatprep.mubr.bf16.mxu0 %v2359_v0  ;;  %588 = vmatprep.mubr.bf16.mxu1 %v2359_v0  ;;  %v1259_v3 = vld [vmem:[%s2355_s1 + $0x14] ss:$8 sps:$4 sm:$0xff]   ;;  %v1261_v4 = vld [vmem:[%s2355_s1 + $0x10] ss:$8 sps:$4 sm:$0xff]   ;;  %v1262_v5 = vld [vmem:[%s2355_s1 + $0x24] ss:$8 sps:$4 sm:$0xff]  }
  0x3d   : > { %396 = vmatprep.subr.bf16.mxu0 %v1256_v1  ;;  %1187 = vmatprep.subr.bf16.mxu1 %v1256_v1  ;;  %s1203_s27 = smul.u32 1536, %s1509_s5  ;;  %v1264_v6 = vld [vmem:[%s2355_s1 + $0x20] ss:$8 sps:$4 sm:$0xff]   ;;  %v1265_v7 = vld [vmem:[%s2355_s1 + $0x34] ss:$8 sps:$4 sm:$0xff]   ;;  %s1070_s22 = scalar_lea.sflag [#allocation4], %s1509_s5 }
  0x3e   : > { %397 = vmatpush1.bf16.msra.mxu0 %v1258_v2  ;;  %1195 = vmatpush1.bf16.msra.mxu1 %v1258_v2  ;;  %v1267_v8 = vld [vmem:[%s2355_s1 + $0x30] ss:$8 sps:$4 sm:$0xff]   ;;  %v1268_v9 = vld [vmem:[%s2355_s1 + $0x44] ss:$8 sps:$4 sm:$0xff]   ;;  %v1270_v17 = vld [vmem:[%s2355_s1 + $0x40] ss:$8 sps:$4 sm:$0xff]  }
  0x3f   : > { %398 = vmatprep.subr.bf16.mxu0 %v1259_v3  ;;  %1188 = vmatprep.subr.bf16.mxu1 %v1259_v3  ;;  %v1550_v10 = vld [vmem:[%s1513_s11] sm:$0xff]  ;;  %v1553_v11 = vld [vmem:[%s1513_s11 + $0x8] sm:$0xff]  ;;  %s1555_s8 = scalar_lea.vmem [#allocation5], %s1203_s27  ;;  %v1572_v14 = vld [vmem:[%s1513_s11 + $0x10] sm:$0xff]  ;;  %s1204_s17 = smul.u32 24576, %s1426_s16 }
  0x40   : > { %1005 = vst [vmem:[%s1555_s8 + $0x10] sm:$0xff] %v1550_v10  ;;  %v1560_v12 = vld [vmem:[%s1513_s11 + $0x100] sm:$0xff]  ;;  %v1563_v13 = vld [vmem:[%s1513_s11 + $0x108] sm:$0xff]  ;;  %1006 = vst [vmem:[%s1555_s8 + $0x28] sm:$0xff] %v1553_v11  ;;  %v256_v52 = vpack.c.bf16 %v1553_v11, %v1550_v10  ;;  %s1084_s19 = sshll.u32 %s1555_s8, 4  ;;  %p2390_p11 = scmp.ne.s32.totalorder %s2365_s24, 0  ;;  %s2304_s19 = int_to_ptr.vmem [resolvable:$true] %s1084_s19 }
  0x41   : > { %1037 = vst [vmem:[%s1555_s8 + $0x310] sm:$0xff] %v1560_v12  ;;  %1038 = vst [vmem:[%s1555_s8 + $0x328] sm:$0xff] %v1563_v13  ;;  %v1575_v15 = vld [vmem:[%s1513_s11 + $0x18] sm:$0xff]  ;;  %v1578_v16 = vld [vmem:[%s1513_s11 + $0x110] sm:$0xff]  ;;  %s2302_s20 = scalar_lea.hbm %s2357_s3, %s1204_s17  ;;  %s1310_s26 = scalar_lea.vmem %s2304_s19, 24576 }
  0x42   : > { %399 = vmatpush1.bf16.msra.mxu0 %v1261_v4  ;;  %1196 = vmatpush1.bf16.msra.mxu1 %v1261_v4  ;;  %1007 = vst [vmem:[%s1555_s8 + $0x40] sm:$0xff] %v1572_v14  ;;  %1008 = vst [vmem:[%s1555_s8 + $0x58] sm:$0xff] %v1575_v15  ;;  %v1588_v18 = vld [vmem:[%s1513_s11 + $0x118] sm:$0xff]  ;;  %v1593_v19 = vld [vmem:[%s1513_s11 + $0x20] sm:$0xff]  ;;  %p1311_p6 = scmp.ne.s32.totalorder %s2304_s19, %s1310_s26  ;;  %s1382_s27 = smov [#allocation5]  }
  0x43   : > { %400 = vmatprep.subr.bf16.mxu0 %v1262_v5  ;;  %1189 = vmatprep.subr.bf16.mxu1 %v1262_v5  ;;  %1039 = vst [vmem:[%s1555_s8 + $0x340] sm:$0xff] %v1578_v16  ;;  %v1596_v20 = vld [vmem:[%s1513_s11 + $0x28] sm:$0xff]  ;;  %v1271_v21 = vld [vmem:[%s2355_s1 + $0x54] ss:$8 sps:$4 sm:$0xff]   ;;  %1040 = vst [vmem:[%s1555_s8 + $0x358] sm:$0xff] %v1588_v18  ;;  %s1314_s28 = sshll.u32 %s1382_s27, 4  ;;  %s1315_s28 = int_to_ptr.vmem [resolvable:$false] %s1314_s28 }
  0x44   : > { %1009 = vst [vmem:[%s1555_s8 + $0x70] sm:$0xff] %v1593_v19  ;;  %1010 = vst [vmem:[%s1555_s8 + $0x88] sm:$0xff] %v1596_v20  ;;  %v1608_v22 = vld [vmem:[%s1513_s11 + $0x120] sm:$0xff]  ;;  %v1611_v23 = vld [vmem:[%s1513_s11 + $0x128] sm:$0xff]  ;;  %p1312_p12 = pnand %p1311_p6, %p2390_p11  ;;  %s1316_s29 = scalar_lea.vmem %s1315_s28, 49152 }
  0x45   : > { %v1614_v24 = vld [vmem:[%s1513_s11 + $0x30] sm:$0xff]  ;;  %1041 = vst [vmem:[%s1555_s8 + $0x370] sm:$0xff] %v1608_v22  ;;  %1042 = vst [vmem:[%s1555_s8 + $0x388] sm:$0xff] %v1611_v23  ;;  %v1621_v25 = vld [vmem:[%s1513_s11 + $0x38] sm:$0xff]  ;;  %p1317_p8 = scmp.lt.s32.totalorder %s2304_s19, %s1315_s28  ;;  %p1318_p10 = scmp.lt.s32.totalorder %s1316_s29, %s1310_s26 }
  0x46   : > { %401 = vmatpush1.bf16.msra.mxu0 %v1264_v6  ;;  %1197 = vmatpush1.bf16.msra.mxu1 %v1264_v6  ;;  %1011 = vst [vmem:[%s1555_s8 + $0xa0] sm:$0xff] %v1614_v24  ;;  %v1626_v26 = vld [vmem:[%s1513_s11 + $0x130] sm:$0xff]  ;;  %v1629_v27 = vld [vmem:[%s1513_s11 + $0x138] sm:$0xff]  ;;  %1012 = vst [vmem:[%s1555_s8 + $0xb8] sm:$0xff] %v1621_v25  ;;  %p1313_p13 = pneg %p1312_p12 }
  0x47   : > { %402 = vmatprep.subr.bf16.mxu0 %v1265_v7  ;;  %1190 = vmatprep.subr.bf16.mxu1 %v1265_v7  ;;  %1043 = vst [vmem:[%s1555_s8 + $0x3a0] sm:$0xff] %v1626_v26  ;;  %1044 = vst [vmem:[%s1555_s8 + $0x3b8] sm:$0xff] %v1629_v27  ;;  %v1638_v28 = vld [vmem:[%s1513_s11 + $0x40] sm:$0xff]  ;;  %v1641_v29 = vld [vmem:[%s1513_s11 + $0x48] sm:$0xff]  ;;  %p1319_p0 = por %p1318_p10, %p1317_p8 }
  0x48   : > { %v1644_v30 = vld [vmem:[%s1513_s11 + $0x140] sm:$0xff]  ;;  %v1273_v31 = vld [vmem:[%s2355_s1 + $0x50] ss:$8 sps:$4 sm:$0xff]   ;;  %1013 = vst [vmem:[%s1555_s8 + $0xd0] sm:$0xff] %v1638_v28  ;;  %1014 = vst [vmem:[%s1555_s8 + $0xe8] sm:$0xff] %v1641_v29 }
  0x49   : > { %v1654_v32 = vld [vmem:[%s1513_s11 + $0x148] sm:$0xff]  ;;  %1045 = vst [vmem:[%s1555_s8 + $0x3d0] sm:$0xff] %v1644_v30  ;;  %v1659_v33 = vld [vmem:[%s1513_s11 + $0x50] sm:$0xff]  ;;  %v1662_v34 = vld [vmem:[%s1513_s11 + $0x58] sm:$0xff]  ;;  %p1320_p2 = pnand %p1319_p0, %p1313_p13 }
  0x4a   : > { %403 = vmatpush1.bf16.msra.mxu0 %v1267_v8  ;;  %1198 = vmatpush1.bf16.msra.mxu1 %v1267_v8  ;;  %v1274_v35 = vld [vmem:[%s2355_s1 + $0x64] ss:$8 sps:$4 sm:$0xff]   ;;  %1046 = vst [vmem:[%s1555_s8 + $0x3e8] sm:$0xff] %v1654_v32  ;;  %1015 = vst [vmem:[%s1555_s8 + $0x100] sm:$0xff] %v1659_v33  ;;  %v1674_v36 = vld [vmem:[%s1513_s11 + $0x150] sm:$0xff] }
  0x4b   : > { %404 = vmatprep.subr.bf16.mxu0 %v1268_v9  ;;  %1191 = vmatprep.subr.bf16.mxu1 %v1268_v9  ;;  %1016 = vst [vmem:[%s1555_s8 + $0x118] sm:$0xff] %v1662_v34  ;;  %v1677_v37 = vld [vmem:[%s1513_s11 + $0x158] sm:$0xff]  ;;  %v1680_v38 = vld [vmem:[%s1513_s11 + $0x60] sm:$0xff]  ;;  %1047 = vst [vmem:[%s1555_s8 + $0x400] sm:$0xff] %v1674_v36 }
  0x4c   : > { %1048 = vst [vmem:[%s1555_s8 + $0x418] sm:$0xff] %v1677_v37  ;;  %v1687_v39 = vld [vmem:[%s1513_s11 + $0x68] sm:$0xff]  ;;  %1017 = vst [vmem:[%s1555_s8 + $0x130] sm:$0xff] %v1680_v38  ;;  %v1692_v40 = vld [vmem:[%s1513_s11 + $0x160] sm:$0xff] }
  0x4d   : > { %v1695_v41 = vld [vmem:[%s1513_s11 + $0x168] sm:$0xff]  ;;  %1018 = vst [vmem:[%s1555_s8 + $0x148] sm:$0xff] %v1687_v39  ;;  %1049 = vst [vmem:[%s1555_s8 + $0x430] sm:$0xff] %v1692_v40  ;;  %v1704_v42 = vld [vmem:[%s1513_s11 + $0x70] sm:$0xff] }
  0x4e   : > { %405 = vmatpush1.bf16.msra.mxu0 %v1270_v17  ;;  %1199 = vmatpush1.bf16.msra.mxu1 %v1270_v17  ;;  %1050 = vst [vmem:[%s1555_s8 + $0x448] sm:$0xff] %v1695_v41  ;;  %v1707_v43 = vld [vmem:[%s1513_s11 + $0x78] sm:$0xff]  ;;  %v1710_v44 = vld [vmem:[%s1513_s11 + $0x170] sm:$0xff]  ;;  %v1276_v45 = vld [vmem:[%s2355_s1 + $0x60] ss:$8 sps:$4 sm:$0xff]  }
  0x4f   : > { %406 = vmatprep.subr.bf16.mxu0 %v1271_v21  ;;  %1192 = vmatprep.subr.bf16.mxu1 %v1271_v21  ;;  %1019 = vst [vmem:[%s1555_s8 + $0x160] sm:$0xff] %v1704_v42  ;;  %1020 = vst [vmem:[%s1555_s8 + $0x178] sm:$0xff] %v1707_v43  ;;  %v1722_v47 = vld [vmem:[%s1513_s11 + $0x178] sm:$0xff]  ;;  %v1727_v48 = vld [vmem:[%s1513_s11 + $0x80] sm:$0xff] }
  0x50   : > { %1051 = vst [vmem:[%s1555_s8 + $0x460] sm:$0xff] %v1710_v44  ;;  %v1730_v49 = vld [vmem:[%s1513_s11 + $0x88] sm:$0xff]  ;;  %v1277_v50 = vld [vmem:[%s2355_s1 + $0x74] ss:$8 sps:$4 sm:$0xff]   ;;  %1052 = vst [vmem:[%s1555_s8 + $0x478] sm:$0xff] %v1722_v47 }
  0x51   : > { %1021 = vst [vmem:[%s1555_s8 + $0x190] sm:$0xff] %v1727_v48  ;;  %1022 = vst [vmem:[%s1555_s8 + $0x1a8] sm:$0xff] %v1730_v49  ;;  %v1746_v53 = vld [vmem:[%s1513_s11 + $0x180] sm:$0xff]  ;;  %v1749_v54 = vld [vmem:[%s1513_s11 + $0x188] sm:$0xff] }
  0x52   : > { %v1752_v55 = vld [vmem:[%s1513_s11 + $0x90] sm:$0xff]  ;;  %407 = vmatpush1.bf16.msra.mxu0 %v1273_v31  ;;  %1200 = vmatpush1.bf16.msra.mxu1 %v1273_v31  ;;  %1053 = vst [vmem:[%s1555_s8 + $0x490] sm:$0xff] %v1746_v53  ;;  %1054 = vst [vmem:[%s1555_s8 + $0x4a8] sm:$0xff] %v1749_v54  ;;  %v1761_v57 = vld [vmem:[%s1513_s11 + $0x98] sm:$0xff]  ;;  %v272_v31 = vpack.c.bf16 %v1563_v13, %v1560_v12  ;;  %v2370_v13 = vmov 0  }
  0x53   : > { %1023 = vst [vmem:[%s1555_s8 + $0x1c0] sm:$0xff] %v1752_v55  ;;  %v1766_v58 = vld [vmem:[%s1513_s11 + $0x190] sm:$0xff]  ;;  %v1769_v59 = vld [vmem:[%s1513_s11 + $0x198] sm:$0xff]  ;;  %408 = vmatprep.subr.bf16.mxu0 %v1274_v35  ;;  %1193 = vmatprep.subr.bf16.mxu1 %v1274_v35  ;;  %1024 = vst [vmem:[%s1555_s8 + $0x1d8] sm:$0xff] %v1761_v57 }
  0x54   : > { %1055 = vst [vmem:[%s1555_s8 + $0x4c0] sm:$0xff] %v1766_v58  ;;  %1056 = vst [vmem:[%s1555_s8 + $0x4d8] sm:$0xff] %v1769_v59  ;;  %v1782_v62 = vld [vmem:[%s1513_s11 + $0xa0] sm:$0xff]  ;;  %v1785_v63 = vld [vmem:[%s1513_s11 + $0xa8] sm:$0xff] }
  0x55   : > { %v1788_v1 = vld [vmem:[%s1513_s11 + $0x1a0] sm:$0xff]  ;;  %v1279_v2 = vld [vmem:[%s2355_s1 + $0x70] ss:$8 sps:$4 sm:$0xff]   ;;  %1025 = vst [vmem:[%s1555_s8 + $0x1f0] sm:$0xff] %v1782_v62  ;;  %1026 = vst [vmem:[%s1555_s8 + $0x208] sm:$0xff] %v1785_v63 }
  0x56   : > { %v1800_v4 = vld [vmem:[%s1513_s11 + $0x1a8] sm:$0xff]  ;;  %1057 = vst [vmem:[%s1555_s8 + $0x4f0] sm:$0xff] %v1788_v1  ;;  %v1805_v5 = vld [vmem:[%s1513_s11 + $0xb0] sm:$0xff]  ;;  %v1808_v6 = vld [vmem:[%s1513_s11 + $0xb8] sm:$0xff]  ;;  %409 = vmatpush1.bf16.msra.mxu0 %v1276_v45  ;;  %1201 = vmatpush1.bf16.msra.mxu1 %v1276_v45 }
  0x57   : > { %1058 = vst [vmem:[%s1555_s8 + $0x508] sm:$0xff] %v1800_v4  ;;  %1027 = vst [vmem:[%s1555_s8 + $0x220] sm:$0xff] %v1805_v5  ;;  %v1821_v9 = vld [vmem:[%s1513_s11 + $0x1b0] sm:$0xff]  ;;  %v1824_v17 = vld [vmem:[%s1513_s11 + $0x1b8] sm:$0xff]  ;;  %410 = vmatprep.subr.bf16.mxu0 %v1277_v50  ;;  %1194 = vmatprep.subr.bf16.mxu1 %v1277_v50 }
  0x58   : > { %1028 = vst [vmem:[%s1555_s8 + $0x238] sm:$0xff] %v1808_v6  ;;  %v1827_v21 = vld [vmem:[%s1513_s11 + $0xc0] sm:$0xff]  ;;  %1059 = vst [vmem:[%s1555_s8 + $0x520] sm:$0xff] %v1821_v9  ;;  %v1836_v35 = vld [vmem:[%s1513_s11 + $0xc8] sm:$0xff] }
  0x59   : > { %1060 = vst [vmem:[%s1555_s8 + $0x538] sm:$0xff] %v1824_v17  ;;  %1029 = vst [vmem:[%s1555_s8 + $0x250] sm:$0xff] %v1827_v21  ;;  %v1841_v8 = vld [vmem:[%s1513_s11 + $0x1c0] sm:$0xff]  ;;  %v1844_v45 = vld [vmem:[%s1513_s11 + $0x1c8] sm:$0xff] }
  0x5a   : > { %1030 = vst [vmem:[%s1555_s8 + $0x268] sm:$0xff] %v1836_v35  ;;  %1061 = vst [vmem:[%s1555_s8 + $0x550] sm:$0xff] %v1841_v8  ;;  %v1857_v3 = vld [vmem:[%s1513_s11 + $0xd0] sm:$0xff]  ;;  %v1860_v61 = vld [vmem:[%s1513_s11 + $0xd8] sm:$0xff]  ;;  %411 = vmatpush1.bf16.msra.mxu0 %v1279_v2  ;;  %1202 = vmatpush1.bf16.msra.mxu1 %v1279_v2 }
  0x5b   : > { %1062 = vst [vmem:[%s1555_s8 + $0x568] sm:$0xff] %v1844_v45  ;;  %v1863_v50 = vld [vmem:[%s1513_s11 + $0x1d0] sm:$0xff]  ;;  %1031 = vst [vmem:[%s1555_s8 + $0x280] sm:$0xff] %v1857_v3  ;;  %v1872_v7 = vld [vmem:[%s1513_s11 + $0x1d8] sm:$0xff] }
  0x5c   : > { %1032 = vst [vmem:[%s1555_s8 + $0x298] sm:$0xff] %v1860_v61  ;;  %1063 = vst [vmem:[%s1555_s8 + $0x580] sm:$0xff] %v1863_v50  ;;  %v1877_v60 = vld [vmem:[%s1513_s11 + $0xe0] sm:$0xff]  ;;  %v1880_v56 = vld [vmem:[%s1513_s11 + $0xe8] sm:$0xff] }
  0x5d   : > { %2368 = vst [vmem:[#allocation8_spill] sm:$0xff] %v1877_v60  ;;  %1064 = vst [vmem:[%s1555_s8 + $0x598] sm:$0xff] %v1872_v7  ;;  %v1897_v10 = vld [vmem:[%s1513_s11 + $0x1e0] sm:$0xff]  ;;  %v1900_v11 = vld [vmem:[%s1513_s11 + $0x1e8] sm:$0xff]  ;;  %429 = vmatmul.mubr.bf16.vlgmr.msra.gmra.mrb[0].mxu0 %v256_v52  ;;  %589 = vmatmul.mubr.bf16.vlgmr.msra.gmra.mrb[0].mxu1 %v272_v31  ;;  %v258_v52 = vpack.c.bf16 %v1596_v20, %v1593_v19  ;;  %v274_v31 = vpack.c.bf16 %v1611_v23, %v1608_v22 }
  0x5e   : > { %1033 = vst [vmem:[%s1555_s8 + $0x2b0] sm:$0xff] %v1877_v60  ;;  %1034 = vst [vmem:[%s1555_s8 + $0x2c8] sm:$0xff] %v1880_v56  ;;  %v1903_v12 = vld [vmem:[%s1513_s11 + $0xf0] sm:$0xff]  ;;  %v1912_v46 = vld [vmem:[%s1513_s11 + $0xf8] sm:$0xff]  ;;  %438 = vmatprep.mubr.bf16.mxu0 %v2370_v13  ;;  %598 = vmatprep.mubr.bf16.mxu1 %v2370_v13  ;;  %v273_v60 = vpack.c.bf16 %v1588_v18, %v1578_v16  ;;  %v260_v16 = vpack.c.bf16 %v1641_v29, %v1638_v28 }
  0x5f   : > { %2369 = vst [vmem:[#allocation9_spill] sm:$0xff] %v1897_v10  ;;  %1065 = vst [vmem:[%s1555_s8 + $0x5b0] sm:$0xff] %v1897_v10  ;;  %v1917_v51 = vld [vmem:[%s1513_s11 + $0x1f0] sm:$0xff]  ;;  %v1920_v0 = vld [vmem:[%s1513_s11 + $0x1f8] sm:$0xff]  ;;  %v257_v10 = vpack.c.bf16 %v1575_v15, %v1572_v14  ;;  %v259_v14 = vpack.c.bf16 %v1621_v25, %v1614_v24  ;;  %v275_v15 = vpack.c.bf16 %v1629_v27, %v1626_v26 }
  0x60   : > { %1066 = vst [vmem:[%s1555_s8 + $0x5c8] sm:$0xff] %v1900_v11  ;;  %1035 = vst [vmem:[%s1555_s8 + $0x2e0] sm:$0xff] %v1903_v12  ;;  %v287_v2 = vpack.c.bf16 %v1920_v0, %v1917_v51  ;;  %v276_v18 = vpack.c.bf16 %v1654_v32, %v1644_v30  ;;  %v261_v19 = vpack.c.bf16 %v1662_v34, %v1659_v33 }
  0x61   : > { %1036 = vst [vmem:[%s1555_s8 + $0x2f8] sm:$0xff] %v1912_v46  ;;  %1067 = vst [vmem:[%s1555_s8 + $0x5e0] sm:$0xff] %v1917_v51  ;;  %v277_v20 = vpack.c.bf16 %v1677_v37, %v1674_v36  ;;  %v262_v22 = vpack.c.bf16 %v1687_v39, %v1680_v38  ;;  %v278_v23 = vpack.c.bf16 %v1695_v41, %v1692_v40 }
  0x62   : > { %1068 = vst [vmem:[%s1555_s8 + $0x5f8] sm:$0xff] %v1920_v0  ;;  %v2371_v24 = vpack.c.bf16 %v1707_v43, %v1704_v42  ;;  %v2372_v25 = vpack.c.bf16 %v1722_v47, %v1710_v44  ;;  %v2373_v26 = vpack.c.bf16 %v1730_v49, %v1727_v48  ;;  %v2374_v27 = vpack.c.bf16 %v1749_v54, %v1746_v53  ;;  %v304_v53 = vld [vmem:[%s2356_s2] sm:$0x3] }
  0x63   : > { %v2375_v28 = vpack.c.bf16 %v1761_v57, %v1752_v55  ;;  %v2376_v29 = vpack.c.bf16 %v1769_v59, %v1766_v58  ;;  %v2377_v30 = vpack.c.bf16 %v1785_v63, %v1782_v62  ;;  %v2378_v32 = vpack.c.bf16 %v1800_v4, %v1788_v1 }
  0x64   : > { %v2379_v33 = vpack.c.bf16 %v1808_v6, %v1805_v5  ;;  %v2380_v34 = vpack.c.bf16 %v1824_v17, %v1821_v9  ;;  %v2381_v36 = vpack.c.bf16 %v1836_v35, %v1827_v21  ;;  %v2382_v37 = vpack.c.bf16 %v1844_v45, %v1841_v8  ;;  %v2385_v40 = vld [vmem:[#allocation8_spill] sm:$0xff] }
  0x65   : > { %439 = vmatmul.mubr.bf16.gmra.mrb[4].mxu0 %v257_v10  ;;  %599 = vmatmul.mubr.bf16.gmra.mrb[4].mxu1 %v273_v60  ;;  %v2383_v38 = vpack.c.bf16 %v1860_v61, %v1857_v3  ;;  %v2384_v39 = vpack.c.bf16 %v1872_v7, %v1863_v50  ;;  %v2386_v41 = vpack.c.bf16 %v1880_v56, %v2385_v40  ;;  %v306_v47 = vlaneseq }
  0x66   : > { %448 = vmatprep.mubr.bf16.mxu0 %v2370_v13  ;;  %608 = vmatprep.mubr.bf16.mxu1 %v2370_v13  ;;  %v2387_v42 = vld [vmem:[#allocation9_spill] sm:$0xff]  ;;  %v2389_v44 = vpack.c.bf16 %v1912_v46, %v1903_v12 }
  0x67   : > { %v2388_v43 = vpack.c.bf16 %v1900_v11, %v2387_v42  ;;  %v307_v48 = vshrl.u32 %v306_v47, 7 }
  0x69   : > { %v308_v49 = vsub.s32 0, %v307_v48  ;;  %v312_v54 = vsub.s32 1, %v307_v48 }
  0x6b   : > { %v2043_v55 = vrot.slane %v304_v53, %v308_v49  ;;  %v2045_v56 = vrot.slane %v304_v53, %v312_v54 }
  0x6d   : > { %449 = vmatmul.mubr.bf16.gmra.mrb[8].mxu0 %v258_v52  ;;  %609 = vmatmul.mubr.bf16.gmra.mrb[8].mxu1 %v274_v31 }
  0x6e   : > { %458 = vmatprep.mubr.bf16.mxu0 %v2370_v13  ;;  %618 = vmatprep.mubr.bf16.mxu1 %v2370_v13 }
  0x75   : > { %459 = vmatmul.mubr.bf16.gmra.mrb[12].mxu0 %v259_v14  ;;  %619 = vmatmul.mubr.bf16.gmra.mrb[12].mxu1 %v275_v15 }
  0x76   : > { %468 = vmatprep.mubr.bf16.mxu0 %v2370_v13  ;;  %628 = vmatprep.mubr.bf16.mxu1 %v2370_v13 }
  0x7d   : > { %469 = vmatmul.mubr.bf16.gmra.mrb[16].mxu0 %v260_v16  ;;  %629 = vmatmul.mubr.bf16.gmra.mrb[16].mxu1 %v276_v18 }
  0x7e   : > { %478 = vmatprep.mubr.bf16.mxu0 %v2370_v13  ;;  %638 = vmatprep.mubr.bf16.mxu1 %v2370_v13 }
  0x85   : > { %479 = vmatmul.mubr.bf16.gmra.mrb[20].mxu0 %v261_v19  ;;  %639 = vmatmul.mubr.bf16.gmra.mrb[20].mxu1 %v277_v20 }
  0x86   : > { %488 = vmatprep.mubr.bf16.mxu0 %v2370_v13  ;;  %648 = vmatprep.mubr.bf16.mxu1 %v2370_v13 }
  0x8d   : > { %489 = vmatmul.mubr.bf16.gmra.mrb[24].mxu0 %v262_v22  ;;  %649 = vmatmul.mubr.bf16.gmra.mrb[24].mxu1 %v278_v23 }
  0x8e   : > { %498 = vmatprep.mubr.bf16.mxu0 %v2370_v13  ;;  %658 = vmatprep.mubr.bf16.mxu1 %v2370_v13 }
  0x95   : > { %499 = vmatmul.mubr.bf16.gmra.mrb[28].mxu0 %v2371_v24  ;;  %659 = vmatmul.mubr.bf16.gmra.mrb[28].mxu1 %v2372_v25 }
  0x96   : > { %508 = vmatprep.mubr.bf16.mxu0 %v2370_v13  ;;  %668 = vmatprep.mubr.bf16.mxu1 %v2370_v13 }
  0x9d   : > { %509 = vmatmul.mubr.bf16.gmra.mrb[32].mxu0 %v2373_v26  ;;  %669 = vmatmul.mubr.bf16.gmra.mrb[32].mxu1 %v2374_v27 }
  0x9e   : > { %518 = vmatprep.mubr.bf16.mxu0 %v2370_v13  ;;  %678 = vmatprep.mubr.bf16.mxu1 %v2370_v13 }
  0xa5   : > { %519 = vmatmul.mubr.bf16.gmra.mrb[36].mxu0 %v2375_v28  ;;  %679 = vmatmul.mubr.bf16.gmra.mrb[36].mxu1 %v2376_v29 }
  0xa6   : > { %528 = vmatprep.mubr.bf16.mxu0 %v2370_v13  ;;  %688 = vmatprep.mubr.bf16.mxu1 %v2370_v13 }
  0xad   : > { %529 = vmatmul.mubr.bf16.gmra.mrb[40].mxu0 %v2377_v30  ;;  %689 = vmatmul.mubr.bf16.gmra.mrb[40].mxu1 %v2378_v32 }
  0xae   : > { %538 = vmatprep.mubr.bf16.mxu0 %v2370_v13  ;;  %698 = vmatprep.mubr.bf16.mxu1 %v2370_v13 }
  0xb5   : > { %539 = vmatmul.mubr.bf16.gmra.mrb[44].mxu0 %v2379_v33  ;;  %699 = vmatmul.mubr.bf16.gmra.mrb[44].mxu1 %v2380_v34 }
  0xb6   : > { %548 = vmatprep.mubr.bf16.mxu0 %v2370_v13  ;;  %708 = vmatprep.mubr.bf16.mxu1 %v2370_v13 }
  0xbd   : > { %549 = vmatmul.mubr.bf16.gmra.mrb[48].mxu0 %v2381_v36  ;;  %709 = vmatmul.mubr.bf16.gmra.mrb[48].mxu1 %v2382_v37 }
  0xbe   : > { %558 = vmatprep.mubr.bf16.mxu0 %v2370_v13  ;;  %718 = vmatprep.mubr.bf16.mxu1 %v2370_v13 }
  0xc5   : > { %559 = vmatmul.mubr.bf16.gmra.mrb[52].mxu0 %v2383_v38  ;;  %719 = vmatmul.mubr.bf16.gmra.mrb[52].mxu1 %v2384_v39 }
  0xc6   : > { %568 = vmatprep.mubr.bf16.mxu0 %v2370_v13  ;;  %728 = vmatprep.mubr.bf16.mxu1 %v2370_v13 }
  0xcd   : > { %569 = vmatmul.mubr.bf16.gmra.mrb[56].mxu0 %v2386_v41  ;;  %729 = vmatmul.mubr.bf16.gmra.mrb[56].mxu1 %v2388_v43 }
  0xce   : > { %578 = vmatprep.mubr.bf16.mxu0 %v2370_v13  ;;  %738 = vmatprep.mubr.bf16.mxu1 %v2370_v13 }
  0xd5   : > { %579 = vmatmul.mubr.bf16.gmra.mrb[60].mxu0 %v2389_v44  ;;  %739 = vmatmul.mubr.bf16.gmra.mrb[60].mxu1 %v287_v2 }
 0x130   : > { %v430_v57 = vpop.f32.mrb[0].mxu0  ;;  %v590_v58 = vpop.f32.mrb[0].mxu1 }
 0x131   : > { %v431_v46 = vadd.f32 %v430_v57, %v2043_v55  ;;  %v591_v59 = vadd.f32 %v590_v58, %v2043_v55  ;;  %v432_v0 = vpop.f32.mrb[1].mxu0  ;;  %v592_v51 = vpop.f32.mrb[1].mxu1 }
 0x132   : > { %v433_v60 = vadd.f32 %v432_v0, %v2045_v56  ;;  %v593_v61 = vadd.f32 %v592_v51, %v2045_v56  ;;  %v434_v62 = vpop.f32.mrb[2].mxu0  ;;  %v594_v63 = vpop.f32.mrb[2].mxu1 }
 0x133   : > { %v749_v1 = vmax.f32 %v431_v46, 0.0  ;;  %v813_v3 = vmax.f32 %v591_v59, 0.0  ;;  %v435_v4 = vadd.f32 %v434_v62, %v2043_v55  ;;  %v595_v5 = vadd.f32 %v594_v63, %v2043_v55  ;;  %v436_v6 = vpop.f32.mrb[3].mxu0  ;;  %v596_v7 = vpop.f32.mrb[3].mxu1 }
 0x134   : > { %v750_v8 = vmax.f32 %v433_v60, 0.0  ;;  %v814_v9 = vmax.f32 %v593_v61, 0.0  ;;  %v437_v17 = vadd.f32 %v436_v6, %v2045_v56  ;;  %v597_v21 = vadd.f32 %v596_v7, %v2045_v56 }
 0x135   : > { %877 = vst [vmem:[%s1555_s8] sm:$0xff] %v749_v1  ;;  %941 = vst [vmem:[%s1555_s8 + $0x300] sm:$0xff] %v813_v3  ;;  %v751_v35 = vmax.f32 %v435_v4, 0.0  ;;  %v815_v45 = vmax.f32 %v595_v5, 0.0 }
 0x136   : > { %878 = vst [vmem:[%s1555_s8 + $0x8] sm:$0xff] %v750_v8  ;;  %942 = vst [vmem:[%s1555_s8 + $0x308] sm:$0xff] %v814_v9  ;;  %v752_v50 = vmax.f32 %v437_v17, 0.0  ;;  %v816_v10 = vmax.f32 %v597_v21, 0.0 }
 0x137   : > { %879 = vst [vmem:[%s1555_s8 + $0x18] sm:$0xff] %v751_v35  ;;  %943 = vst [vmem:[%s1555_s8 + $0x318] sm:$0xff] %v815_v45 }
 0x138   : > { %880 = vst [vmem:[%s1555_s8 + $0x20] sm:$0xff] %v752_v50  ;;  %944 = vst [vmem:[%s1555_s8 + $0x320] sm:$0xff] %v816_v10  ;;  %v440_v11 = vpop.f32.mrb[4].mxu0  ;;  %v600_v12 = vpop.f32.mrb[4].mxu1 }
 0x139   : > { %v441_v13 = vadd.f32 %v440_v11, %v2043_v55  ;;  %v601_v2 = vadd.f32 %v600_v12, %v2043_v55  ;;  %v442_v52 = vpop.f32.mrb[5].mxu0  ;;  %v602_v31 = vpop.f32.mrb[5].mxu1 }
 0x13a   : > { %v443_v14 = vadd.f32 %v442_v52, %v2045_v56  ;;  %v603_v15 = vadd.f32 %v602_v31, %v2045_v56  ;;  %v444_v16 = vpop.f32.mrb[6].mxu0  ;;  %v604_v18 = vpop.f32.mrb[6].mxu1 }
 0x13b   : > { %v753_v19 = vmax.f32 %v441_v13, 0.0  ;;  %v817_v20 = vmax.f32 %v601_v2, 0.0  ;;  %v445_v22 = vadd.f32 %v444_v16, %v2043_v55  ;;  %v605_v23 = vadd.f32 %v604_v18, %v2043_v55  ;;  %v446_v24 = vpop.f32.mrb[7].mxu0  ;;  %v606_v25 = vpop.f32.mrb[7].mxu1 }
 0x13c   : > { %v754_v26 = vmax.f32 %v443_v14, 0.0  ;;  %v818_v27 = vmax.f32 %v603_v15, 0.0  ;;  %v447_v28 = vadd.f32 %v446_v24, %v2045_v56  ;;  %v607_v29 = vadd.f32 %v606_v25, %v2045_v56 }
 0x13d   : > { %881 = vst [vmem:[%s1555_s8 + $0x30] sm:$0xff] %v753_v19  ;;  %945 = vst [vmem:[%s1555_s8 + $0x330] sm:$0xff] %v817_v20  ;;  %v755_v30 = vmax.f32 %v445_v22, 0.0  ;;  %v819_v32 = vmax.f32 %v605_v23, 0.0 }
 0x13e   : > { %882 = vst [vmem:[%s1555_s8 + $0x38] sm:$0xff] %v754_v26  ;;  %946 = vst [vmem:[%s1555_s8 + $0x338] sm:$0xff] %v818_v27  ;;  %v756_v33 = vmax.f32 %v447_v28, 0.0  ;;  %v820_v34 = vmax.f32 %v607_v29, 0.0 }
 0x13f   : > { %883 = vst [vmem:[%s1555_s8 + $0x48] sm:$0xff] %v755_v30  ;;  %947 = vst [vmem:[%s1555_s8 + $0x348] sm:$0xff] %v819_v32 }
 0x140   : > { %884 = vst [vmem:[%s1555_s8 + $0x50] sm:$0xff] %v756_v33  ;;  %948 = vst [vmem:[%s1555_s8 + $0x350] sm:$0xff] %v820_v34  ;;  %v450_v36 = vpop.f32.mrb[8].mxu0  ;;  %v610_v37 = vpop.f32.mrb[8].mxu1 }
 0x141   : > { %v451_v38 = vadd.f32 %v450_v36, %v2043_v55  ;;  %v611_v39 = vadd.f32 %v610_v37, %v2043_v55  ;;  %v452_v40 = vpop.f32.mrb[9].mxu0  ;;  %v612_v41 = vpop.f32.mrb[9].mxu1 }
 0x142   : > { %v453_v42 = vadd.f32 %v452_v40, %v2045_v56  ;;  %v613_v43 = vadd.f32 %v612_v41, %v2045_v56  ;;  %v454_v44 = vpop.f32.mrb[10].mxu0  ;;  %v614_v47 = vpop.f32.mrb[10].mxu1 }
 0x143   : > { %v757_v48 = vmax.f32 %v451_v38, 0.0  ;;  %v821_v49 = vmax.f32 %v611_v39, 0.0  ;;  %v455_v53 = vadd.f32 %v454_v44, %v2043_v55  ;;  %v615_v54 = vadd.f32 %v614_v47, %v2043_v55  ;;  %v456_v57 = vpop.f32.mrb[11].mxu0  ;;  %v616_v58 = vpop.f32.mrb[11].mxu1 }
 0x144   : > { %v758_v46 = vmax.f32 %v453_v42, 0.0  ;;  %v822_v59 = vmax.f32 %v613_v43, 0.0  ;;  %v457_v0 = vadd.f32 %v456_v57, %v2045_v56  ;;  %v617_v51 = vadd.f32 %v616_v58, %v2045_v56 }
 0x145   : > { %885 = vst [vmem:[%s1555_s8 + $0x60] sm:$0xff] %v757_v48  ;;  %949 = vst [vmem:[%s1555_s8 + $0x360] sm:$0xff] %v821_v49  ;;  %v759_v60 = vmax.f32 %v455_v53, 0.0  ;;  %v823_v61 = vmax.f32 %v615_v54, 0.0 }
 0x146   : > { %886 = vst [vmem:[%s1555_s8 + $0x68] sm:$0xff] %v758_v46  ;;  %950 = vst [vmem:[%s1555_s8 + $0x368] sm:$0xff] %v822_v59  ;;  %v760_v62 = vmax.f32 %v457_v0, 0.0  ;;  %v824_v63 = vmax.f32 %v617_v51, 0.0 }
 0x147   : > { %887 = vst [vmem:[%s1555_s8 + $0x78] sm:$0xff] %v759_v60  ;;  %951 = vst [vmem:[%s1555_s8 + $0x378] sm:$0xff] %v823_v61 }
 0x148   : > { %888 = vst [vmem:[%s1555_s8 + $0x80] sm:$0xff] %v760_v62  ;;  %952 = vst [vmem:[%s1555_s8 + $0x380] sm:$0xff] %v824_v63  ;;  %v460_v1 = vpop.f32.mrb[12].mxu0  ;;  %v620_v3 = vpop.f32.mrb[12].mxu1 }
 0x149   : > { %v461_v4 = vadd.f32 %v460_v1, %v2043_v55  ;;  %v621_v5 = vadd.f32 %v620_v3, %v2043_v55  ;;  %v462_v6 = vpop.f32.mrb[13].mxu0  ;;  %v622_v7 = vpop.f32.mrb[13].mxu1 }
 0x14a   : > { %v463_v8 = vadd.f32 %v462_v6, %v2045_v56  ;;  %v623_v9 = vadd.f32 %v622_v7, %v2045_v56  ;;  %v464_v17 = vpop.f32.mrb[14].mxu0  ;;  %v624_v21 = vpop.f32.mrb[14].mxu1 }
 0x14b   : > { %v761_v35 = vmax.f32 %v461_v4, 0.0  ;;  %v825_v45 = vmax.f32 %v621_v5, 0.0  ;;  %v465_v50 = vadd.f32 %v464_v17, %v2043_v55  ;;  %v625_v10 = vadd.f32 %v624_v21, %v2043_v55  ;;  %v466_v11 = vpop.f32.mrb[15].mxu0  ;;  %v626_v12 = vpop.f32.mrb[15].mxu1 }
 0x14c   : > { %v762_v13 = vmax.f32 %v463_v8, 0.0  ;;  %v826_v2 = vmax.f32 %v623_v9, 0.0  ;;  %v467_v52 = vadd.f32 %v466_v11, %v2045_v56  ;;  %v627_v31 = vadd.f32 %v626_v12, %v2045_v56 }
 0x14d   : > { %889 = vst [vmem:[%s1555_s8 + $0x90] sm:$0xff] %v761_v35  ;;  %953 = vst [vmem:[%s1555_s8 + $0x390] sm:$0xff] %v825_v45  ;;  %v763_v14 = vmax.f32 %v465_v50, 0.0  ;;  %v827_v15 = vmax.f32 %v625_v10, 0.0 }
 0x14e   : > { %890 = vst [vmem:[%s1555_s8 + $0x98] sm:$0xff] %v762_v13  ;;  %954 = vst [vmem:[%s1555_s8 + $0x398] sm:$0xff] %v826_v2  ;;  %v764_v16 = vmax.f32 %v467_v52, 0.0  ;;  %v828_v18 = vmax.f32 %v627_v31, 0.0 }
 0x14f   : > { %891 = vst [vmem:[%s1555_s8 + $0xa8] sm:$0xff] %v763_v14  ;;  %955 = vst [vmem:[%s1555_s8 + $0x3a8] sm:$0xff] %v827_v15 }
 0x150   : > { %892 = vst [vmem:[%s1555_s8 + $0xb0] sm:$0xff] %v764_v16  ;;  %956 = vst [vmem:[%s1555_s8 + $0x3b0] sm:$0xff] %v828_v18  ;;  %v470_v19 = vpop.f32.mrb[16].mxu0  ;;  %v630_v20 = vpop.f32.mrb[16].mxu1 }
 0x151   : > { %v471_v22 = vadd.f32 %v470_v19, %v2043_v55  ;;  %v631_v23 = vadd.f32 %v630_v20, %v2043_v55  ;;  %v472_v24 = vpop.f32.mrb[17].mxu0  ;;  %v632_v25 = vpop.f32.mrb[17].mxu1 }
 0x152   : > { %v473_v26 = vadd.f32 %v472_v24, %v2045_v56  ;;  %v633_v27 = vadd.f32 %v632_v25, %v2045_v56  ;;  %v474_v28 = vpop.f32.mrb[18].mxu0  ;;  %v634_v29 = vpop.f32.mrb[18].mxu1 }
 0x153   : > { %v765_v30 = vmax.f32 %v471_v22, 0.0  ;;  %v829_v32 = vmax.f32 %v631_v23, 0.0  ;;  %v475_v33 = vadd.f32 %v474_v28, %v2043_v55  ;;  %v635_v34 = vadd.f32 %v634_v29, %v2043_v55  ;;  %v476_v36 = vpop.f32.mrb[19].mxu0  ;;  %v636_v37 = vpop.f32.mrb[19].mxu1 }
 0x154   : > { %v766_v38 = vmax.f32 %v473_v26, 0.0  ;;  %v830_v39 = vmax.f32 %v633_v27, 0.0  ;;  %v477_v40 = vadd.f32 %v476_v36, %v2045_v56  ;;  %v637_v41 = vadd.f32 %v636_v37, %v2045_v56 }
 0x155   : > { %893 = vst [vmem:[%s1555_s8 + $0xc0] sm:$0xff] %v765_v30  ;;  %957 = vst [vmem:[%s1555_s8 + $0x3c0] sm:$0xff] %v829_v32  ;;  %v767_v42 = vmax.f32 %v475_v33, 0.0  ;;  %v831_v43 = vmax.f32 %v635_v34, 0.0 }
 0x156   : > { %894 = vst [vmem:[%s1555_s8 + $0xc8] sm:$0xff] %v766_v38  ;;  %958 = vst [vmem:[%s1555_s8 + $0x3c8] sm:$0xff] %v830_v39  ;;  %v768_v44 = vmax.f32 %v477_v40, 0.0  ;;  %v832_v47 = vmax.f32 %v637_v41, 0.0 }
 0x157   : > { %895 = vst [vmem:[%s1555_s8 + $0xd8] sm:$0xff] %v767_v42  ;;  %959 = vst [vmem:[%s1555_s8 + $0x3d8] sm:$0xff] %v831_v43 }
 0x158   : > { %896 = vst [vmem:[%s1555_s8 + $0xe0] sm:$0xff] %v768_v44  ;;  %960 = vst [vmem:[%s1555_s8 + $0x3e0] sm:$0xff] %v832_v47  ;;  %v480_v48 = vpop.f32.mrb[20].mxu0  ;;  %v640_v49 = vpop.f32.mrb[20].mxu1 }
 0x159   : > { %v481_v53 = vadd.f32 %v480_v48, %v2043_v55  ;;  %v641_v54 = vadd.f32 %v640_v49, %v2043_v55  ;;  %v482_v57 = vpop.f32.mrb[21].mxu0  ;;  %v642_v58 = vpop.f32.mrb[21].mxu1 }
 0x15a   : > { %v483_v46 = vadd.f32 %v482_v57, %v2045_v56  ;;  %v643_v59 = vadd.f32 %v642_v58, %v2045_v56  ;;  %v484_v0 = vpop.f32.mrb[22].mxu0  ;;  %v644_v51 = vpop.f32.mrb[22].mxu1 }
 0x15b   : > { %v769_v60 = vmax.f32 %v481_v53, 0.0  ;;  %v833_v61 = vmax.f32 %v641_v54, 0.0  ;;  %v485_v62 = vadd.f32 %v484_v0, %v2043_v55  ;;  %v645_v63 = vadd.f32 %v644_v51, %v2043_v55  ;;  %v486_v1 = vpop.f32.mrb[23].mxu0  ;;  %v646_v3 = vpop.f32.mrb[23].mxu1 }
 0x15c   : > { %v770_v4 = vmax.f32 %v483_v46, 0.0  ;;  %v834_v5 = vmax.f32 %v643_v59, 0.0  ;;  %v487_v6 = vadd.f32 %v486_v1, %v2045_v56  ;;  %v647_v7 = vadd.f32 %v646_v3, %v2045_v56 }
 0x15d   : > { %897 = vst [vmem:[%s1555_s8 + $0xf0] sm:$0xff] %v769_v60  ;;  %961 = vst [vmem:[%s1555_s8 + $0x3f0] sm:$0xff] %v833_v61  ;;  %v771_v8 = vmax.f32 %v485_v62, 0.0  ;;  %v835_v9 = vmax.f32 %v645_v63, 0.0 }
 0x15e   : > { %898 = vst [vmem:[%s1555_s8 + $0xf8] sm:$0xff] %v770_v4  ;;  %962 = vst [vmem:[%s1555_s8 + $0x3f8] sm:$0xff] %v834_v5  ;;  %v772_v17 = vmax.f32 %v487_v6, 0.0  ;;  %v836_v21 = vmax.f32 %v647_v7, 0.0 }
 0x15f   : > { %899 = vst [vmem:[%s1555_s8 + $0x108] sm:$0xff] %v771_v8  ;;  %963 = vst [vmem:[%s1555_s8 + $0x408] sm:$0xff] %v835_v9 }
 0x160   : > { %900 = vst [vmem:[%s1555_s8 + $0x110] sm:$0xff] %v772_v17  ;;  %964 = vst [vmem:[%s1555_s8 + $0x410] sm:$0xff] %v836_v21  ;;  %v490_v35 = vpop.f32.mrb[24].mxu0  ;;  %v650_v45 = vpop.f32.mrb[24].mxu1 }
 0x161   : > { %v491_v50 = vadd.f32 %v490_v35, %v2043_v55  ;;  %v651_v10 = vadd.f32 %v650_v45, %v2043_v55  ;;  %v492_v11 = vpop.f32.mrb[25].mxu0  ;;  %v652_v12 = vpop.f32.mrb[25].mxu1 }
 0x162   : > { %v493_v13 = vadd.f32 %v492_v11, %v2045_v56  ;;  %v653_v2 = vadd.f32 %v652_v12, %v2045_v56  ;;  %v494_v52 = vpop.f32.mrb[26].mxu0  ;;  %v654_v31 = vpop.f32.mrb[26].mxu1 }
 0x163   : > { %v773_v14 = vmax.f32 %v491_v50, 0.0  ;;  %v837_v15 = vmax.f32 %v651_v10, 0.0  ;;  %v495_v16 = vadd.f32 %v494_v52, %v2043_v55  ;;  %v655_v18 = vadd.f32 %v654_v31, %v2043_v55  ;;  %v496_v19 = vpop.f32.mrb[27].mxu0  ;;  %v656_v20 = vpop.f32.mrb[27].mxu1 }
 0x164   : > { %v774_v22 = vmax.f32 %v493_v13, 0.0  ;;  %v838_v23 = vmax.f32 %v653_v2, 0.0  ;;  %v497_v24 = vadd.f32 %v496_v19, %v2045_v56  ;;  %v657_v25 = vadd.f32 %v656_v20, %v2045_v56 }
 0x165   : > { %901 = vst [vmem:[%s1555_s8 + $0x120] sm:$0xff] %v773_v14  ;;  %965 = vst [vmem:[%s1555_s8 + $0x420] sm:$0xff] %v837_v15  ;;  %v775_v26 = vmax.f32 %v495_v16, 0.0  ;;  %v839_v27 = vmax.f32 %v655_v18, 0.0 }
 0x166   : > { %902 = vst [vmem:[%s1555_s8 + $0x128] sm:$0xff] %v774_v22  ;;  %966 = vst [vmem:[%s1555_s8 + $0x428] sm:$0xff] %v838_v23  ;;  %v776_v28 = vmax.f32 %v497_v24, 0.0  ;;  %v840_v29 = vmax.f32 %v657_v25, 0.0 }
 0x167   : > { %903 = vst [vmem:[%s1555_s8 + $0x138] sm:$0xff] %v775_v26  ;;  %967 = vst [vmem:[%s1555_s8 + $0x438] sm:$0xff] %v839_v27 }
 0x168   : > { %904 = vst [vmem:[%s1555_s8 + $0x140] sm:$0xff] %v776_v28  ;;  %968 = vst [vmem:[%s1555_s8 + $0x440] sm:$0xff] %v840_v29  ;;  %v500_v30 = vpop.f32.mrb[28].mxu0  ;;  %v660_v32 = vpop.f32.mrb[28].mxu1 }
 0x169   : > { %v501_v33 = vadd.f32 %v500_v30, %v2043_v55  ;;  %v661_v34 = vadd.f32 %v660_v32, %v2043_v55  ;;  %v502_v36 = vpop.f32.mrb[29].mxu0  ;;  %v662_v37 = vpop.f32.mrb[29].mxu1 }
 0x16a   : > { %v503_v38 = vadd.f32 %v502_v36, %v2045_v56  ;;  %v663_v39 = vadd.f32 %v662_v37, %v2045_v56  ;;  %v504_v40 = vpop.f32.mrb[30].mxu0  ;;  %v664_v41 = vpop.f32.mrb[30].mxu1 }
 0x16b   : > { %v777_v42 = vmax.f32 %v501_v33, 0.0  ;;  %v841_v43 = vmax.f32 %v661_v34, 0.0  ;;  %v505_v44 = vadd.f32 %v504_v40, %v2043_v55  ;;  %v665_v47 = vadd.f32 %v664_v41, %v2043_v55  ;;  %v506_v48 = vpop.f32.mrb[31].mxu0  ;;  %v666_v49 = vpop.f32.mrb[31].mxu1 }
 0x16c   : > { %v778_v53 = vmax.f32 %v503_v38, 0.0  ;;  %v842_v54 = vmax.f32 %v663_v39, 0.0  ;;  %v507_v57 = vadd.f32 %v506_v48, %v2045_v56  ;;  %v667_v58 = vadd.f32 %v666_v49, %v2045_v56 }
 0x16d   : > { %905 = vst [vmem:[%s1555_s8 + $0x150] sm:$0xff] %v777_v42  ;;  %969 = vst [vmem:[%s1555_s8 + $0x450] sm:$0xff] %v841_v43  ;;  %v779_v46 = vmax.f32 %v505_v44, 0.0  ;;  %v843_v59 = vmax.f32 %v665_v47, 0.0 }
 0x16e   : > { %906 = vst [vmem:[%s1555_s8 + $0x158] sm:$0xff] %v778_v53  ;;  %970 = vst [vmem:[%s1555_s8 + $0x458] sm:$0xff] %v842_v54  ;;  %v780_v0 = vmax.f32 %v507_v57, 0.0  ;;  %v844_v51 = vmax.f32 %v667_v58, 0.0 }
 0x16f   : > { %907 = vst [vmem:[%s1555_s8 + $0x168] sm:$0xff] %v779_v46  ;;  %971 = vst [vmem:[%s1555_s8 + $0x468] sm:$0xff] %v843_v59 }
 0x170   : > { %908 = vst [vmem:[%s1555_s8 + $0x170] sm:$0xff] %v780_v0  ;;  %972 = vst [vmem:[%s1555_s8 + $0x470] sm:$0xff] %v844_v51  ;;  %v510_v60 = vpop.f32.mrb[32].mxu0  ;;  %v670_v61 = vpop.f32.mrb[32].mxu1 }
 0x171   : > { %v511_v62 = vadd.f32 %v510_v60, %v2043_v55  ;;  %v671_v63 = vadd.f32 %v670_v61, %v2043_v55  ;;  %v512_v1 = vpop.f32.mrb[33].mxu0  ;;  %v672_v3 = vpop.f32.mrb[33].mxu1 }
 0x172   : > { %v513_v4 = vadd.f32 %v512_v1, %v2045_v56  ;;  %v673_v5 = vadd.f32 %v672_v3, %v2045_v56  ;;  %v514_v6 = vpop.f32.mrb[34].mxu0  ;;  %v674_v7 = vpop.f32.mrb[34].mxu1 }
 0x173   : > { %v781_v8 = vmax.f32 %v511_v62, 0.0  ;;  %v845_v9 = vmax.f32 %v671_v63, 0.0  ;;  %v515_v17 = vadd.f32 %v514_v6, %v2043_v55  ;;  %v675_v21 = vadd.f32 %v674_v7, %v2043_v55  ;;  %v516_v35 = vpop.f32.mrb[35].mxu0  ;;  %v676_v45 = vpop.f32.mrb[35].mxu1 }
 0x174   : > { %v782_v50 = vmax.f32 %v513_v4, 0.0  ;;  %v846_v10 = vmax.f32 %v673_v5, 0.0  ;;  %v517_v11 = vadd.f32 %v516_v35, %v2045_v56  ;;  %v677_v12 = vadd.f32 %v676_v45, %v2045_v56 }
 0x175   : > { %909 = vst [vmem:[%s1555_s8 + $0x180] sm:$0xff] %v781_v8  ;;  %973 = vst [vmem:[%s1555_s8 + $0x480] sm:$0xff] %v845_v9  ;;  %v783_v13 = vmax.f32 %v515_v17, 0.0  ;;  %v847_v2 = vmax.f32 %v675_v21, 0.0 }
 0x176   : > { %910 = vst [vmem:[%s1555_s8 + $0x188] sm:$0xff] %v782_v50  ;;  %974 = vst [vmem:[%s1555_s8 + $0x488] sm:$0xff] %v846_v10  ;;  %v784_v52 = vmax.f32 %v517_v11, 0.0  ;;  %v848_v31 = vmax.f32 %v677_v12, 0.0 }
 0x177   : > { %911 = vst [vmem:[%s1555_s8 + $0x198] sm:$0xff] %v783_v13  ;;  %975 = vst [vmem:[%s1555_s8 + $0x498] sm:$0xff] %v847_v2 }
 0x178   : > { %912 = vst [vmem:[%s1555_s8 + $0x1a0] sm:$0xff] %v784_v52  ;;  %976 = vst [vmem:[%s1555_s8 + $0x4a0] sm:$0xff] %v848_v31  ;;  %v520_v14 = vpop.f32.mrb[36].mxu0  ;;  %v680_v15 = vpop.f32.mrb[36].mxu1 }
 0x179   : > { %v521_v16 = vadd.f32 %v520_v14, %v2043_v55  ;;  %v681_v18 = vadd.f32 %v680_v15, %v2043_v55  ;;  %v522_v19 = vpop.f32.mrb[37].mxu0  ;;  %v682_v20 = vpop.f32.mrb[37].mxu1 }
 0x17a   : > { %v523_v22 = vadd.f32 %v522_v19, %v2045_v56  ;;  %v683_v23 = vadd.f32 %v682_v20, %v2045_v56  ;;  %v524_v24 = vpop.f32.mrb[38].mxu0  ;;  %v684_v25 = vpop.f32.mrb[38].mxu1 }
 0x17b   : > { %v785_v26 = vmax.f32 %v521_v16, 0.0  ;;  %v849_v27 = vmax.f32 %v681_v18, 0.0  ;;  %v525_v28 = vadd.f32 %v524_v24, %v2043_v55  ;;  %v685_v29 = vadd.f32 %v684_v25, %v2043_v55  ;;  %v526_v30 = vpop.f32.mrb[39].mxu0  ;;  %v686_v32 = vpop.f32.mrb[39].mxu1 }
 0x17c   : > { %v786_v33 = vmax.f32 %v523_v22, 0.0  ;;  %v850_v34 = vmax.f32 %v683_v23, 0.0  ;;  %v527_v36 = vadd.f32 %v526_v30, %v2045_v56  ;;  %v687_v37 = vadd.f32 %v686_v32, %v2045_v56 }
 0x17d   : > { %913 = vst [vmem:[%s1555_s8 + $0x1b0] sm:$0xff] %v785_v26  ;;  %977 = vst [vmem:[%s1555_s8 + $0x4b0] sm:$0xff] %v849_v27  ;;  %v787_v38 = vmax.f32 %v525_v28, 0.0  ;;  %v851_v39 = vmax.f32 %v685_v29, 0.0 }
 0x17e   : > { %914 = vst [vmem:[%s1555_s8 + $0x1b8] sm:$0xff] %v786_v33  ;;  %978 = vst [vmem:[%s1555_s8 + $0x4b8] sm:$0xff] %v850_v34  ;;  %v788_v40 = vmax.f32 %v527_v36, 0.0  ;;  %v852_v41 = vmax.f32 %v687_v37, 0.0 }
 0x17f   : > { %915 = vst [vmem:[%s1555_s8 + $0x1c8] sm:$0xff] %v787_v38  ;;  %979 = vst [vmem:[%s1555_s8 + $0x4c8] sm:$0xff] %v851_v39 }
 0x180   : > { %916 = vst [vmem:[%s1555_s8 + $0x1d0] sm:$0xff] %v788_v40  ;;  %980 = vst [vmem:[%s1555_s8 + $0x4d0] sm:$0xff] %v852_v41  ;;  %v530_v42 = vpop.f32.mrb[40].mxu0  ;;  %v690_v43 = vpop.f32.mrb[40].mxu1 }
 0x181   : > { %v531_v44 = vadd.f32 %v530_v42, %v2043_v55  ;;  %v691_v47 = vadd.f32 %v690_v43, %v2043_v55  ;;  %v532_v48 = vpop.f32.mrb[41].mxu0  ;;  %v692_v49 = vpop.f32.mrb[41].mxu1 }
 0x182   : > { %v533_v53 = vadd.f32 %v532_v48, %v2045_v56  ;;  %v693_v54 = vadd.f32 %v692_v49, %v2045_v56  ;;  %v534_v57 = vpop.f32.mrb[42].mxu0  ;;  %v694_v58 = vpop.f32.mrb[42].mxu1 }
 0x183   : > { %v789_v46 = vmax.f32 %v531_v44, 0.0  ;;  %v853_v59 = vmax.f32 %v691_v47, 0.0  ;;  %v535_v0 = vadd.f32 %v534_v57, %v2043_v55  ;;  %v695_v51 = vadd.f32 %v694_v58, %v2043_v55  ;;  %v536_v60 = vpop.f32.mrb[43].mxu0  ;;  %v696_v61 = vpop.f32.mrb[43].mxu1 }
 0x184   : > { %v790_v62 = vmax.f32 %v533_v53, 0.0  ;;  %v854_v63 = vmax.f32 %v693_v54, 0.0  ;;  %v537_v1 = vadd.f32 %v536_v60, %v2045_v56  ;;  %v697_v3 = vadd.f32 %v696_v61, %v2045_v56 }
 0x185   : > { %917 = vst [vmem:[%s1555_s8 + $0x1e0] sm:$0xff] %v789_v46  ;;  %981 = vst [vmem:[%s1555_s8 + $0x4e0] sm:$0xff] %v853_v59  ;;  %v791_v4 = vmax.f32 %v535_v0, 0.0  ;;  %v855_v5 = vmax.f32 %v695_v51, 0.0 }
 0x186   : > { %918 = vst [vmem:[%s1555_s8 + $0x1e8] sm:$0xff] %v790_v62  ;;  %982 = vst [vmem:[%s1555_s8 + $0x4e8] sm:$0xff] %v854_v63  ;;  %v792_v6 = vmax.f32 %v537_v1, 0.0  ;;  %v856_v7 = vmax.f32 %v697_v3, 0.0 }
 0x187   : > { %919 = vst [vmem:[%s1555_s8 + $0x1f8] sm:$0xff] %v791_v4  ;;  %983 = vst [vmem:[%s1555_s8 + $0x4f8] sm:$0xff] %v855_v5 }
 0x188   : > { %920 = vst [vmem:[%s1555_s8 + $0x200] sm:$0xff] %v792_v6  ;;  %984 = vst [vmem:[%s1555_s8 + $0x500] sm:$0xff] %v856_v7  ;;  %v540_v8 = vpop.f32.mrb[44].mxu0  ;;  %v700_v9 = vpop.f32.mrb[44].mxu1 }
 0x189   : > { %v541_v17 = vadd.f32 %v540_v8, %v2043_v55  ;;  %v701_v21 = vadd.f32 %v700_v9, %v2043_v55  ;;  %v542_v35 = vpop.f32.mrb[45].mxu0  ;;  %v702_v45 = vpop.f32.mrb[45].mxu1 }
 0x18a   : > { %v543_v50 = vadd.f32 %v542_v35, %v2045_v56  ;;  %v703_v10 = vadd.f32 %v702_v45, %v2045_v56  ;;  %v544_v11 = vpop.f32.mrb[46].mxu0  ;;  %v704_v12 = vpop.f32.mrb[46].mxu1 }
 0x18b   : > { %v793_v13 = vmax.f32 %v541_v17, 0.0  ;;  %v857_v2 = vmax.f32 %v701_v21, 0.0  ;;  %v545_v52 = vadd.f32 %v544_v11, %v2043_v55  ;;  %v705_v31 = vadd.f32 %v704_v12, %v2043_v55  ;;  %v546_v14 = vpop.f32.mrb[47].mxu0  ;;  %v706_v15 = vpop.f32.mrb[47].mxu1 }
 0x18c   : > { %v794_v16 = vmax.f32 %v543_v50, 0.0  ;;  %v858_v18 = vmax.f32 %v703_v10, 0.0  ;;  %v547_v19 = vadd.f32 %v546_v14, %v2045_v56  ;;  %v707_v20 = vadd.f32 %v706_v15, %v2045_v56 }
 0x18d   : > { %921 = vst [vmem:[%s1555_s8 + $0x210] sm:$0xff] %v793_v13  ;;  %985 = vst [vmem:[%s1555_s8 + $0x510] sm:$0xff] %v857_v2  ;;  %v795_v22 = vmax.f32 %v545_v52, 0.0  ;;  %v859_v23 = vmax.f32 %v705_v31, 0.0 }
 0x18e   : > { %922 = vst [vmem:[%s1555_s8 + $0x218] sm:$0xff] %v794_v16  ;;  %986 = vst [vmem:[%s1555_s8 + $0x518] sm:$0xff] %v858_v18  ;;  %v796_v24 = vmax.f32 %v547_v19, 0.0  ;;  %v860_v25 = vmax.f32 %v707_v20, 0.0 }
 0x18f   : > { %923 = vst [vmem:[%s1555_s8 + $0x228] sm:$0xff] %v795_v22  ;;  %987 = vst [vmem:[%s1555_s8 + $0x528] sm:$0xff] %v859_v23 }
 0x190   : > { %924 = vst [vmem:[%s1555_s8 + $0x230] sm:$0xff] %v796_v24  ;;  %988 = vst [vmem:[%s1555_s8 + $0x530] sm:$0xff] %v860_v25  ;;  %v550_v26 = vpop.f32.mrb[48].mxu0  ;;  %v710_v27 = vpop.f32.mrb[48].mxu1 }
 0x191   : > { %v551_v28 = vadd.f32 %v550_v26, %v2043_v55  ;;  %v711_v29 = vadd.f32 %v710_v27, %v2043_v55  ;;  %v552_v30 = vpop.f32.mrb[49].mxu0  ;;  %v712_v32 = vpop.f32.mrb[49].mxu1 }
 0x192   : > { %v553_v33 = vadd.f32 %v552_v30, %v2045_v56  ;;  %v713_v34 = vadd.f32 %v712_v32, %v2045_v56  ;;  %v554_v36 = vpop.f32.mrb[50].mxu0  ;;  %v714_v37 = vpop.f32.mrb[50].mxu1 }
 0x193   : > { %v797_v38 = vmax.f32 %v551_v28, 0.0  ;;  %v861_v39 = vmax.f32 %v711_v29, 0.0  ;;  %v555_v40 = vadd.f32 %v554_v36, %v2043_v55  ;;  %v715_v41 = vadd.f32 %v714_v37, %v2043_v55  ;;  %v556_v42 = vpop.f32.mrb[51].mxu0  ;;  %v716_v43 = vpop.f32.mrb[51].mxu1 }
 0x194   : > { %v798_v44 = vmax.f32 %v553_v33, 0.0  ;;  %v862_v47 = vmax.f32 %v713_v34, 0.0  ;;  %v557_v48 = vadd.f32 %v556_v42, %v2045_v56  ;;  %v717_v49 = vadd.f32 %v716_v43, %v2045_v56 }
 0x195   : > { %925 = vst [vmem:[%s1555_s8 + $0x240] sm:$0xff] %v797_v38  ;;  %989 = vst [vmem:[%s1555_s8 + $0x540] sm:$0xff] %v861_v39  ;;  %v799_v53 = vmax.f32 %v555_v40, 0.0  ;;  %v863_v54 = vmax.f32 %v715_v41, 0.0 }
 0x196   : > { %926 = vst [vmem:[%s1555_s8 + $0x248] sm:$0xff] %v798_v44  ;;  %990 = vst [vmem:[%s1555_s8 + $0x548] sm:$0xff] %v862_v47  ;;  %v800_v57 = vmax.f32 %v557_v48, 0.0  ;;  %v864_v58 = vmax.f32 %v717_v49, 0.0 }
 0x197   : > { %927 = vst [vmem:[%s1555_s8 + $0x258] sm:$0xff] %v799_v53  ;;  %991 = vst [vmem:[%s1555_s8 + $0x558] sm:$0xff] %v863_v54 }
 0x198   : > { %928 = vst [vmem:[%s1555_s8 + $0x260] sm:$0xff] %v800_v57  ;;  %992 = vst [vmem:[%s1555_s8 + $0x560] sm:$0xff] %v864_v58  ;;  %v560_v46 = vpop.f32.mrb[52].mxu0  ;;  %v720_v59 = vpop.f32.mrb[52].mxu1 }
 0x199   : > { %v561_v0 = vadd.f32 %v560_v46, %v2043_v55  ;;  %v721_v51 = vadd.f32 %v720_v59, %v2043_v55  ;;  %v562_v60 = vpop.f32.mrb[53].mxu0  ;;  %v722_v61 = vpop.f32.mrb[53].mxu1 }
 0x19a   : > { %v563_v62 = vadd.f32 %v562_v60, %v2045_v56  ;;  %v723_v63 = vadd.f32 %v722_v61, %v2045_v56  ;;  %v564_v1 = vpop.f32.mrb[54].mxu0  ;;  %v724_v3 = vpop.f32.mrb[54].mxu1 }
 0x19b   : > { %v801_v4 = vmax.f32 %v561_v0, 0.0  ;;  %v865_v5 = vmax.f32 %v721_v51, 0.0  ;;  %v565_v6 = vadd.f32 %v564_v1, %v2043_v55  ;;  %v725_v7 = vadd.f32 %v724_v3, %v2043_v55  ;;  %v566_v8 = vpop.f32.mrb[55].mxu0  ;;  %v726_v9 = vpop.f32.mrb[55].mxu1 }
 0x19c   : > { %v802_v17 = vmax.f32 %v563_v62, 0.0  ;;  %v866_v21 = vmax.f32 %v723_v63, 0.0  ;;  %v567_v35 = vadd.f32 %v566_v8, %v2045_v56  ;;  %v727_v45 = vadd.f32 %v726_v9, %v2045_v56 }
 0x19d   : > { %929 = vst [vmem:[%s1555_s8 + $0x270] sm:$0xff] %v801_v4  ;;  %993 = vst [vmem:[%s1555_s8 + $0x570] sm:$0xff] %v865_v5  ;;  %v803_v50 = vmax.f32 %v565_v6, 0.0  ;;  %v867_v10 = vmax.f32 %v725_v7, 0.0 }
 0x19e   : > { %930 = vst [vmem:[%s1555_s8 + $0x278] sm:$0xff] %v802_v17  ;;  %994 = vst [vmem:[%s1555_s8 + $0x578] sm:$0xff] %v866_v21  ;;  %v804_v11 = vmax.f32 %v567_v35, 0.0  ;;  %v868_v12 = vmax.f32 %v727_v45, 0.0 }
 0x19f   : > { %931 = vst [vmem:[%s1555_s8 + $0x288] sm:$0xff] %v803_v50  ;;  %995 = vst [vmem:[%s1555_s8 + $0x588] sm:$0xff] %v867_v10 }
 0x1a0   : > { %932 = vst [vmem:[%s1555_s8 + $0x290] sm:$0xff] %v804_v11  ;;  %996 = vst [vmem:[%s1555_s8 + $0x590] sm:$0xff] %v868_v12  ;;  %v570_v13 = vpop.f32.mrb[56].mxu0  ;;  %v730_v2 = vpop.f32.mrb[56].mxu1 }
 0x1a1   : > { %v571_v52 = vadd.f32 %v570_v13, %v2043_v55  ;;  %v731_v31 = vadd.f32 %v730_v2, %v2043_v55  ;;  %v572_v14 = vpop.f32.mrb[57].mxu0  ;;  %v732_v15 = vpop.f32.mrb[57].mxu1 }
 0x1a2   : > { %v573_v16 = vadd.f32 %v572_v14, %v2045_v56  ;;  %v733_v18 = vadd.f32 %v732_v15, %v2045_v56  ;;  %v574_v19 = vpop.f32.mrb[58].mxu0  ;;  %v734_v20 = vpop.f32.mrb[58].mxu1 }
 0x1a3   : > { %v805_v22 = vmax.f32 %v571_v52, 0.0  ;;  %v869_v23 = vmax.f32 %v731_v31, 0.0  ;;  %v575_v24 = vadd.f32 %v574_v19, %v2043_v55  ;;  %v735_v25 = vadd.f32 %v734_v20, %v2043_v55  ;;  %v576_v26 = vpop.f32.mrb[59].mxu0  ;;  %v736_v27 = vpop.f32.mrb[59].mxu1 }
 0x1a4   : > { %v806_v28 = vmax.f32 %v573_v16, 0.0  ;;  %v870_v29 = vmax.f32 %v733_v18, 0.0  ;;  %v577_v30 = vadd.f32 %v576_v26, %v2045_v56  ;;  %v737_v32 = vadd.f32 %v736_v27, %v2045_v56 }
 0x1a5   : > { %933 = vst [vmem:[%s1555_s8 + $0x2a0] sm:$0xff] %v805_v22  ;;  %997 = vst [vmem:[%s1555_s8 + $0x5a0] sm:$0xff] %v869_v23  ;;  %v807_v33 = vmax.f32 %v575_v24, 0.0  ;;  %v871_v34 = vmax.f32 %v735_v25, 0.0 }
 0x1a6   : > { %934 = vst [vmem:[%s1555_s8 + $0x2a8] sm:$0xff] %v806_v28  ;;  %998 = vst [vmem:[%s1555_s8 + $0x5a8] sm:$0xff] %v870_v29  ;;  %v808_v36 = vmax.f32 %v577_v30, 0.0  ;;  %v872_v37 = vmax.f32 %v737_v32, 0.0 }
 0x1a7   : > { %935 = vst [vmem:[%s1555_s8 + $0x2b8] sm:$0xff] %v807_v33  ;;  %999 = vst [vmem:[%s1555_s8 + $0x5b8] sm:$0xff] %v871_v34 }
 0x1a8   : > { %936 = vst [vmem:[%s1555_s8 + $0x2c0] sm:$0xff] %v808_v36  ;;  %1000 = vst [vmem:[%s1555_s8 + $0x5c0] sm:$0xff] %v872_v37  ;;  %v580_v38 = vpop.f32.mrb[60].mxu0  ;;  %v740_v39 = vpop.f32.mrb[60].mxu1 }
 0x1a9   : > { %v581_v40 = vadd.f32 %v580_v38, %v2043_v55  ;;  %v741_v41 = vadd.f32 %v740_v39, %v2043_v55  ;;  %v582_v42 = vpop.f32.mrb[61].mxu0  ;;  %v742_v43 = vpop.f32.mrb[61].mxu1 }
 0x1aa   : > { %v583_v44 = vadd.f32 %v582_v42, %v2045_v56  ;;  %v743_v47 = vadd.f32 %v742_v43, %v2045_v56  ;;  %v584_v48 = vpop.f32.mrb[62].mxu0  ;;  %v744_v49 = vpop.f32.mrb[62].mxu1 }
 0x1ab   : > { %v809_v53 = vmax.f32 %v581_v40, 0.0  ;;  %v873_v54 = vmax.f32 %v741_v41, 0.0  ;;  %v585_v57 = vadd.f32 %v584_v48, %v2043_v55  ;;  %v745_v58 = vadd.f32 %v744_v49, %v2043_v55  ;;  %v586_v46 = vpop.f32.mrb[63].mxu0  ;;  %v746_v59 = vpop.f32.mrb[63].mxu1 }
 0x1ac   : > { %v810_v0 = vmax.f32 %v583_v44, 0.0  ;;  %v874_v51 = vmax.f32 %v743_v47, 0.0  ;;  %v587_v60 = vadd.f32 %v586_v46, %v2045_v56  ;;  %v747_v61 = vadd.f32 %v746_v59, %v2045_v56 }
 0x1ad   : > { %937 = vst [vmem:[%s1555_s8 + $0x2d0] sm:$0xff] %v809_v53  ;;  %1001 = vst [vmem:[%s1555_s8 + $0x5d0] sm:$0xff] %v873_v54  ;;  %v811_v62 = vmax.f32 %v585_v57, 0.0  ;;  %v875_v63 = vmax.f32 %v745_v58, 0.0 }
 0x1ae   : > { %938 = vst [vmem:[%s1555_s8 + $0x2d8] sm:$0xff] %v810_v0  ;;  %1002 = vst [vmem:[%s1555_s8 + $0x5d8] sm:$0xff] %v874_v51  ;;  %v812_v55 = vmax.f32 %v587_v60, 0.0  ;;  %v876_v1 = vmax.f32 %v747_v61, 0.0 }
 0x1af   : > { %939 = vst [vmem:[%s1555_s8 + $0x2e8] sm:$0xff] %v811_v62  ;;  %1003 = vst [vmem:[%s1555_s8 + $0x5e8] sm:$0xff] %v875_v63 }
 0x1b0   : > { %940 = vst [vmem:[%s1555_s8 + $0x2f0] sm:$0xff] %v812_v55  ;;  %1004 = vst [vmem:[%s1555_s8 + $0x5f0] sm:$0xff] %v876_v1 }
 0x1b1   : > { %1323 = shalt.err (!%p1320_p2)
}
 0x1b2   : > { %s1324_s8 = scalar_lea.hbm %s2302_s20, 24576  ;;  %s1328_s10 = scalar_lea.hbm %s2357_s3, 49152 }
 0x1b3   : > { %p1325_p4 = scmp.ne.s32.totalorder %s2302_s20, %s1324_s8  ;;  %p1329_p9 = scmp.lt.u32.totalorder %s2302_s20, %s2357_s3 }
 0x1b4   : > { %p1330_p1 = scmp.lt.u32.totalorder %s1328_s10, %s1324_s8  ;;  %p1332_p6 = scmp.lt.u32.totalorder %s1324_s8, %s2302_s20 }
 0x1b5   : > { %p1326_p5 = pnand %p1325_p4, %p2390_p11 }
 0x1b6   : > { %p1331_p3 = por %p1330_p1, %p1329_p9 }
 0x1b7   : > { %p1327_p7 = pneg %p1326_p5 }
 0x1b8   : > { %p1333_p12 = por %p1332_p6, %p1331_p3 }
 0x1ba   : > { %p1334_p13 = pnand %p1333_p12, %p1327_p7 }
 0x1bc   : > { %1337 = shalt.err (!%p1334_p13)
}
 0x1bd   : > { %s1383_s11 = smov 384   ;;  %s1384_s7 = smov 24  }
 0x1be   : > { %1207 = dma.vmem_to_hbm [thread:$0]  (%p2390_p11), %s2304_s19, 24576, %s2302_s20, %s1070_s22, %s1383_s11, %s1383_s11, %s1384_s7  }
 0x1bf PF: > { %s1099_s17 = sand.u32 1, %s1364_s12   ;;  %p2391_p8 = scmp.ne.s32.totalorder %s2366_s25, 0 }
 0x1c0   : > { %p2392_p10 = scmp.ge.s32.totalorder %s1376_s15, 2  ;;  %s1100_s16 = scalar_lea.sflag [#allocation4], %s1099_s17 }
 0x1c2   : > { %p1214_p0 = pnand %p2392_p10, %p2391_p8 }
 0x1c4   : > { %1359 = dma.done.wait (!%p1214_p0), %s1100_s16, 24576  }
 0x1c5   : > { %1361 = vsyncadd (!%p1214_p0), %s1100_s16, 4294942720  ;;  %p16_p2 = scmp.ge.s32.totalorder %s1430_s18, 4   ;;  %s2393_s12 = smov %s1368_s13 }
 0x1c6   : > { %s2394_s13 = smov %s1372_s14  ;;  %s2395_s14 = smov %s1442_s21 }
 0x1c7   : > { %s2396_s15 = smov %s1430_s18  ;;  %18 = sbr.rel (!%p16_p2) target bundleno = 5 (0x5), region = 77 }
 0x1ce   :  { %1105 = vsyncpa [#allocation3], 1 }
 0x1cf   :  { %1107 = vsyncpa [#allocation3 + $0x1], 1 }
 0x1d0   :  { %1108 = vsyncpa [#allocation4], 1 }
 0x1d1   :  { %1110 = vsyncpa [#allocation4 + $0x1], 1 }

</bundles_post_ra>
